<compile_context>
chip_gen: v7x
topology: tpu7x:2x2x1
jax: 0.10.0
libtpu: 0.0.40
codegen_flags: <defaults>
</compile_context>

<pallas_src>
import math
import functools

import jax
import jax.numpy as jnp
from jax.experimental import pallas as pl
from jax.experimental.pallas import tpu as pltpu


COMPUTE_DTYPE = jnp.bfloat16          # MXU input dtype (accumulation is f32)
VMEM_LIMIT_BYTES = 48 * 1024 * 1024   # headroom below v7x's 64 MiB / TensorCore


def _pick_tile(dim, prefs):
    """Largest preferred tile that evenly divides `dim`, else the full dim."""
    for p in prefs:
        if dim >= p and dim % p == 0:
            return p
    return dim


def _cparams():
    return pltpu.CompilerParams(
        dimension_semantics=("parallel", "parallel"),
        vmem_limit_bytes=VMEM_LIMIT_BYTES)


def _layer_norm(x, gamma, beta, eps=1e-5):
    mu = jnp.mean(x, axis=-1, keepdims=True)
    var = jnp.mean((x - mu) * (x - mu), axis=-1, keepdims=True)
    return (x - mu) * jax.lax.rsqrt(var + eps) * gamma + beta


# ---------------------------------------------------------------------------
# Kernels
# ---------------------------------------------------------------------------

def qkv_proj_kernel(x_ref, wqkv_ref, bqkv_ref, q_ref, k_ref, v_ref, *, nhead):
    """Fused Q/K/V projection for one (batch, seq-tile) block.

    x: (1, TS, D) f32; wqkv: (D, 3D) bf16 = [Wq*scale | Wk | Wv];
    bqkv: (1, 3D) f32.  Outputs q/k/v in head-split layout (1, H, TS, dh) bf16
    so the attention kernel uses leading-batch-dim einsums with no in-kernel
    transpose.  The 1/sqrt(dh) attention scale is folded into Wq/bq on host.
    """
    x = x_ref[0].astype(COMPUTE_DTYPE)                       # (TS, D)
    D = x.shape[-1]
    dh = D // nhead

    proj = (jnp.dot(x, wqkv_ref[...], preferred_element_type=jnp.float32)
            + bqkv_ref[...])                                 # (TS, 3D) f32

    for h in range(nhead):                                   # head-split stores
        lo = h * dh
        hi = (h + 1) * dh
        q_ref[0, h] = proj[:, lo:hi].astype(q_ref.dtype)
        k_ref[0, h] = proj[:, D + lo:D + hi].astype(k_ref.dtype)
        v_ref[0, h] = proj[:, 2 * D + lo:2 * D + hi].astype(v_ref.dtype)


def attn_ffn_kernel(x_ref, q_ref, k_ref, v_ref,
                    wo_ref, bo_ref, w1_ref, b1_ref, w2_ref, b2_ref,
                    g1_ref, be1_ref, g2_ref, be2_ref,
                    o_ref, *, nhead):
    """Attention (resident Q tile vs. full-sequence K/V) + Wo + LN1 + FFN + LN2."""
    x = x_ref[0]                                    # (TQ, D)    f32 residual
    q = q_ref[0]                                    # (H, TQ, dh) bf16, pre-scaled
    k = k_ref[0]                                    # (H, S,  dh) bf16
    v = v_ref[0]                                    # (H, S,  dh) bf16

    # Head-batched scores (scale already folded into q), softmax in f32.
    s = jnp.einsum("hqd,hkd->hqk", q, k,
                   preferred_element_type=jnp.float32)         # (H, TQ, S)
    s = s - jnp.max(s, axis=-1, keepdims=True)
    p = jnp.exp(s)
    p = p * pl.reciprocal(jnp.sum(p, axis=-1, keepdims=True), approx=True)
    pv = jnp.einsum("hqk,hkd->hqd", p.astype(v.dtype), v,
                    preferred_element_type=jnp.float32)        # (H, TQ, dh)

    # Output projection folded per head: attn = sum_h pv_h @ Wo_h + bo
    # (avoids concatenating heads / transposing the head axis).
    acc = None
    for h in range(nhead):
        part = jnp.dot(pv[h].astype(wo_ref.dtype), wo_ref[h],
                       preferred_element_type=jnp.float32)     # (TQ, D)
        acc = part if acc is None else acc + part
    attn = acc + bo_ref[...]

    # Residual + LayerNorm 1 (dropout = identity in eval).
    y1 = _layer_norm(x + attn, g1_ref[...], be1_ref[...])

    # Feed-forward (ReLU, PyTorch default) + residual + LayerNorm 2.
    h1 = (jnp.dot(y1.astype(w1_ref.dtype), w1_ref[...],
                  preferred_element_type=jnp.float32) + b1_ref[...])
    h1 = jnp.maximum(h1, 0.0)
    y2 = (jnp.dot(h1.astype(w2_ref.dtype), w2_ref[...],
                  preferred_element_type=jnp.float32) + b2_ref[...])
    o_ref[0] = _layer_norm(y1 + y2, g2_ref[...], be2_ref[...])


def fc_kernel(x_ref, w_ref, b_ref, o_ref):
    # Final classifier tile: (TM, D) @ (D, TV) + (1, TV)
    o_ref[...] = (jnp.dot(x_ref[...].astype(w_ref.dtype), w_ref[...],
                          preferred_element_type=jnp.float32) + b_ref[...])


# ---------------------------------------------------------------------------
# Wrappers
# ---------------------------------------------------------------------------

def run_qkv_proj(x, layer, nhead, seq_tile):
    B, S, D = x.shape
    dh = D // nhead
    TS = seq_tile
    grid = (B, S // TS)

    def wspec(shape):
        return pl.BlockSpec(shape, lambda b, t: (0,) * len(shape))

    qkv_spec = pl.BlockSpec((1, nhead, TS, dh), lambda b, t: (b, 0, t, 0))
    qkv_shape = jax.ShapeDtypeStruct((B, nhead, S, dh), COMPUTE_DTYPE)
    return pl.pallas_call(
        functools.partial(qkv_proj_kernel, nhead=nhead),
        out_shape=(qkv_shape, qkv_shape, qkv_shape),
        grid=grid,
        in_specs=[pl.BlockSpec((1, TS, D), lambda b, t: (b, t, 0)),
                  wspec((D, 3 * D)), wspec((1, 3 * D))],
        out_specs=(qkv_spec, qkv_spec, qkv_spec),
        compiler_params=_cparams(),
    )(x, layer["wqkv"], layer["bqkv"])


def run_attn_ffn(x, q, k, v, layer, nhead, q_tile):
    # TODO(synk): for very long sequences add a K-tile grid axis with online
    #             softmax; for very large d_model keep the weights in pl.ANY
    #             and DMA them once into single-buffered VMEM scratch.
    B, S, D = x.shape
    dh = D // nhead
    F = layer["w1"].shape[1]
    TQ = q_tile
    grid = (B, S // TQ)

    def wspec(shape):
        return pl.BlockSpec(shape, lambda b, t: (0,) * len(shape))

    in_specs = [
        pl.BlockSpec((1, TQ, D), lambda b, t: (b, t, 0)),             # x (residual)
        pl.BlockSpec((1, nhead, TQ, dh), lambda b, t: (b, 0, t, 0)),  # q tile
        pl.BlockSpec((1, nhead, S, dh), lambda b, t: (b, 0, 0, 0)),   # k (full seq)
        pl.BlockSpec((1, nhead, S, dh), lambda b, t: (b, 0, 0, 0)),   # v (full seq)
        wspec((nhead, dh, D)), wspec((1, D)),                         # wo, bo
        wspec((D, F)), wspec((1, F)),                                 # w1, b1
        wspec((F, D)), wspec((1, D)),                                 # w2, b2
        wspec((1, D)), wspec((1, D)),                                 # ln1 g, b
        wspec((1, D)), wspec((1, D)),                                 # ln2 g, b
    ]
    return pl.pallas_call(
        functools.partial(attn_ffn_kernel, nhead=nhead),
        out_shape=jax.ShapeDtypeStruct((B, S, D), jnp.float32),
        grid=grid,
        in_specs=in_specs,
        out_specs=pl.BlockSpec((1, TQ, D), lambda b, t: (b, t, 0)),
        compiler_params=_cparams(),
    )(x, q, k, v,
      layer["wo"], layer["bo"], layer["w1"], layer["b1"],
      layer["w2"], layer["b2"],
      layer["g1"], layer["be1"], layer["g2"], layer["be2"])


def run_fc(x2d, wfc, bfc):
    M, D = x2d.shape
    V = wfc.shape[1]
    TM = _pick_tile(M, (512, 256, 128))
    TV = _pick_tile(V, (2048, 1024, 512, 256, 128))
    grid = (M // TM, V // TV)
    return pl.pallas_call(
        fc_kernel,
        out_shape=jax.ShapeDtypeStruct((M, V), jnp.float32),
        grid=grid,
        in_specs=[pl.BlockSpec((TM, D), lambda i, j: (i, 0)),
                  pl.BlockSpec((D, TV), lambda i, j: (0, j)),
                  pl.BlockSpec((1, TV), lambda i, j: (0, j))],
        out_specs=pl.BlockSpec((TM, TV), lambda i, j: (i, j)),
        compiler_params=_cparams(),
    )(x2d, wfc, bfc)


def enhanced_transformer_forward(src, kparams, *, d_model, nhead):
    B, S = src.shape
    # Embedding gather + positional encoding.  sqrt(d_model) is pre-folded into
    # the embedding table (prepare_params), so this is a single gather + add
    # that XLA fuses into one HBM pass before the first layer kernel.
    # TODO(synk): for very large embedding tables, gather rows in-kernel via
    #             manual DMA instead of jnp.take.
    x = jnp.take(kparams["emb"], src, axis=0) + kparams["pe"][:S][None]
    seq_tile = _pick_tile(S, (256, 128))
    for layer in kparams["layers"]:
        q, k, v = run_qkv_proj(x, layer, nhead, seq_tile)
        x = run_attn_ffn(x, q, k, v, layer, nhead, seq_tile)
    # dropout = identity in eval.
    logits = run_fc(x.reshape(B * S, d_model), kparams["wfc"], kparams["bfc"])
    return logits.reshape(B, S, -1)


# ---------------------------------------------------------------------------
# Parameter construction
# ---------------------------------------------------------------------------

def make_positional_encoding(max_len, d_model):
    position = jnp.arange(max_len, dtype=jnp.float32)[:, None]
    div_term = jnp.exp(jnp.arange(0, d_model, 2, dtype=jnp.float32)
                       * (-math.log(10000.0) / d_model))
    pe = jnp.zeros((max_len, d_model), dtype=jnp.float32)
    pe = pe.at[:, 0::2].set(jnp.sin(position * div_term))
    pe = pe.at[:, 1::2].set(jnp.cos(position * div_term))
    return pe


def init_params(key, vocab_size, d_model, nhead, num_layers, dff, max_len=512):
    def nrm(k, shape, s=0.02):
        return jax.random.normal(k, shape, dtype=jnp.float32) * s

    keys = jax.random.split(key, 2 + num_layers)
    params = {
        "emb": nrm(keys[0], (vocab_size, d_model), 0.5),
        "pe": make_positional_encoding(max_len, d_model),
        "layers": [],
    }
    for l in range(num_layers):
        lk = jax.random.split(keys[2 + l], 10)
        layer = {
            "wq": nrm(lk[0], (d_model, d_model)), "bq": nrm(lk[1], (1, d_model)),
            "wk": nrm(lk[2], (d_model, d_model)), "bk": nrm(lk[3], (1, d_model)),
            "wv": nrm(lk[4], (d_model, d_model)), "bv": nrm(lk[5], (1, d_model)),
            "wo": nrm(lk[6], (d_model, d_model)), "bo": nrm(lk[7], (1, d_model)),
            "w1": nrm(lk[8], (d_model, dff)), "b1": jnp.zeros((1, dff), jnp.float32),
            "w2": nrm(lk[9], (dff, d_model)), "b2": jnp.zeros((1, d_model), jnp.float32),
            "g1": jnp.ones((1, d_model), jnp.float32),
            "be1": jnp.zeros((1, d_model), jnp.float32),
            "g2": jnp.ones((1, d_model), jnp.float32),
            "be2": jnp.zeros((1, d_model), jnp.float32),
        }
        params["layers"].append(layer)
    fk = jax.random.split(keys[1], 2)
    params["wfc"] = nrm(fk[0], (d_model, vocab_size))
    params["bfc"] = nrm(fk[1], (1, vocab_size))
    return params


def prepare_params(params, nhead):
    """Kernel-friendly parameters: bf16 weights (f32 biases / LN params),
    1/sqrt(dh) folded into Wq/bq, Wq/Wk/Wv concatenated into one (D, 3D) weight,
    Wo reshaped to per-head (H, dh, D), sqrt(d_model) folded into the embedding."""
    d_model = params["emb"].shape[1]
    dh = d_model // nhead
    scale = 1.0 / math.sqrt(dh)
    out = {
        "emb": params["emb"] * math.sqrt(d_model),
        "pe": params["pe"],
        "wfc": params["wfc"].astype(COMPUTE_DTYPE),
        "bfc": params["bfc"],
        "layers": [],
    }
    for L in params["layers"]:
        wqkv = jnp.concatenate([L["wq"] * scale, L["wk"], L["wv"]], axis=1)
        bqkv = jnp.concatenate([L["bq"] * scale, L["bk"], L["bv"]], axis=1)
        out["layers"].append({
            "wqkv": wqkv.astype(COMPUTE_DTYPE),
            "bqkv": bqkv,
            "wo": L["wo"].reshape(nhead, dh, d_model).astype(COMPUTE_DTYPE),
            "bo": L["bo"],
            "w1": L["w1"].astype(COMPUTE_DTYPE), "b1": L["b1"],
            "w2": L["w2"].astype(COMPUTE_DTYPE), "b2": L["b2"],
            "g1": L["g1"], "be1": L["be1"], "g2": L["g2"], "be2": L["be2"],
        })
    return out


# ---------------------------------------------------------------------------
# Pure-JAX f32 reference (same math) for a correctness check
# ---------------------------------------------------------------------------

def ref_forward(src, params, *, d_model, nhead):
    B, S = src.shape
    x = jnp.take(params["emb"], src, axis=0) * math.sqrt(d_model) + params["pe"][:S][None]
    dh = d_model // nhead

    def ln(v, g, b, eps=1e-5):
        mu = jnp.mean(v, -1, keepdims=True)
        var = jnp.mean((v - mu) ** 2, -1, keepdims=True)
        return (v - mu) * jax.lax.rsqrt(var + eps) * g + b

    for L in params["layers"]:
        q = x @ L["wq"] + L["bq"]
        k = x @ L["wk"] + L["bk"]
        v = x @ L["wv"] + L["bv"]
        q = q.reshape(B, S, nhead, dh)
        k = k.reshape(B, S, nhead, dh)
        v = v.reshape(B, S, nhead, dh)
        s = jnp.einsum("bqhd,bkhd->bhqk", q, k) / math.sqrt(dh)
        p = jax.nn.softmax(s, axis=-1)
        a = jnp.einsum("bhqk,bkhd->bqhd", p, v).reshape(B, S, d_model)
        a = a @ L["wo"] + L["bo"]
        y1 = ln(x + a, L["g1"], L["be1"])
        h1 = jnp.maximum(y1 @ L["w1"] + L["b1"], 0.0)
        y2 = h1 @ L["w2"] + L["b2"]
        x = ln(y1 + y2, L["g2"], L["be2"])
    return x @ params["wfc"] + params["bfc"]


# ---------------------------------------------------------------------------

if __name__ == "__main__":
    VOCAB, D_MODEL, NHEAD, NLAYERS, DFF = 64, 32, 4, 2, 64
    B, S = 2, 8

    key = jax.random.PRNGKey(0)
    pkey, skey = jax.random.split(key)
    params = init_params(pkey, VOCAB, D_MODEL, NHEAD, NLAYERS, DFF)
    kparams = prepare_params(params, NHEAD)
    src = jax.random.randint(skey, (B, S), 0, VOCAB, dtype=jnp.int32)

    fwd = jax.jit(functools.partial(enhanced_transformer_forward,
                                    d_model=D_MODEL, nhead=NHEAD))
    out = jax.block_until_ready(fwd(src, kparams))

    ref = ref_forward(src, params, d_model=D_MODEL, nhead=NHEAD)
    assert out.shape == (B, S, VOCAB)
    max_err = float(jnp.max(jnp.abs(out - ref)))
    assert jnp.allclose(out, ref, rtol=1e-2, atol=1e-2), (
        f"mismatch vs reference (bf16 MXU / f32 accum), max abs err={max_err}")

    print("KERNEL_OK")
</pallas_src>

<mosaic_0001>
module attributes {stable_mosaic.version = 11 : i64} {
  func.func @fc_kernel(%arg0: i32, %arg1: i32, %arg2: memref<16x32xf32, #tpu.memory_space<vmem>>, %arg3: memref<32x64xbf16, #tpu.memory_space<vmem>>, %arg4: memref<1x64xf32, #tpu.memory_space<vmem>>, %arg5: memref<16x64xf32, #tpu.memory_space<vmem>>) attributes {dimension_semantics = [#tpu.dimension_semantics<parallel>, #tpu.dimension_semantics<parallel>], iteration_bounds = array<i64: 1, 1>, scalar_prefetch = 0 : i64, scratch_operands = 0 : i64, tpu.core_type = #tpu.core_type<tc>, window_params = [{transform_indices = @transform_0, window_bounds = array<i64: 16, 32>}, {transform_indices = @transform_1, window_bounds = array<i64: 32, 64>}, {transform_indices = @transform_2, window_bounds = array<i64: 1, 64>}, {transform_indices = @transform_3, window_bounds = array<i64: 16, 64>}]} {
    %c0 = arith.constant 0 : index
    %c0_0 = arith.constant 0 : index
    %0 = vector.load %arg2[%c0, %c0_0] : memref<16x32xf32, #tpu.memory_space<vmem>>, vector<16x32xf32>
    %1 = arith.truncf %0 : vector<16x32xf32> to vector<16x32xbf16>
    %c0_1 = arith.constant 0 : index
    %c0_2 = arith.constant 0 : index
    %2 = vector.load %arg3[%c0_1, %c0_2] : memref<32x64xbf16, #tpu.memory_space<vmem>>, vector<32x64xbf16>
    %cst = arith.constant dense<0.000000e+00> : vector<16x64xf32>
    %3 = tpu.matmul %1, %2, %cst {dimension_numbers = #tpu.dot_dimension_numbers<[1], [0], [0], [1], [0, 0, 1, 1], [], []>} : vector<16x32xbf16>, vector<32x64xbf16>, vector<16x64xf32> -> vector<16x64xf32>
    %c0_3 = arith.constant 0 : index
    %c0_4 = arith.constant 0 : index
    %4 = vector.load %arg4[%c0_3, %c0_4] : memref<1x64xf32, #tpu.memory_space<vmem>>, vector<1x64xf32>
    %5 = vector.broadcast %4 : vector<1x64xf32> to vector<16x64xf32>
    %6 = arith.addf %3, %5 : vector<16x64xf32>
    %c0_5 = arith.constant 0 : index
    %c0_6 = arith.constant 0 : index
    %7 = vector.load %arg5[%c0_5, %c0_6] : memref<16x64xf32, #tpu.memory_space<vmem>>, vector<16x64xf32>
    tpu.vector_store %arg5[%c0_5, %c0_6], %6 {strides = array<i32>} : memref<16x64xf32, #tpu.memory_space<vmem>>, vector<16x64xf32>,
    return
  }
  func.func @transform_0(%arg0: i32, %arg1: i32) -> (i32, i32) {
    %c0_i32 = arith.constant 0 : i32
    %c0_i32_0 = arith.constant 0 : i32
    return %arg0, %c0_i32 : i32, i32
  }
  func.func @transform_1(%arg0: i32, %arg1: i32) -> (i32, i32) {
    %c0_i32 = arith.constant 0 : i32
    %c0_i32_0 = arith.constant 0 : i32
    return %c0_i32, %arg1 : i32, i32
  }
  func.func @transform_2(%arg0: i32, %arg1: i32) -> (i32, i32) {
    %c0_i32 = arith.constant 0 : i32
    %c0_i32_0 = arith.constant 0 : i32
    return %c0_i32, %arg1 : i32, i32
  }
  func.func @transform_3(%arg0: i32, %arg1: i32) -> (i32, i32) {
    %c0_i32 = arith.constant 0 : i32
    return %arg0, %arg1 : i32, i32
  }
}

module attributes {stable_mosaic.version = 11 : i64} {
  func.func @qkv_proj_kernel(%arg0: i32, %arg1: i32, %arg2: memref<1x8x32xf32, #tpu.memory_space<vmem>>, %arg3: memref<32x96xbf16, #tpu.memory_space<vmem>>, %arg4: memref<1x96xf32, #tpu.memory_space<vmem>>, %arg5: memref<1x4x8x8xbf16, #tpu.memory_space<vmem>>, %arg6: memref<1x4x8x8xbf16, #tpu.memory_space<vmem>>, %arg7: memref<1x4x8x8xbf16, #tpu.memory_space<vmem>>) attributes {dimension_semantics = [#tpu.dimension_semantics<parallel>, #tpu.dimension_semantics<parallel>], iteration_bounds = array<i64: 2, 1>, scalar_prefetch = 0 : i64, scratch_operands = 0 : i64, tpu.core_type = #tpu.core_type<tc>, window_params = [{transform_indices = @transform_0, window_bounds = array<i64: 1, 8, 32>}, {pipeline_mode = #tpu.pipeline_mode<synchronous>, transform_indices = @transform_1, window_bounds = array<i64: 32, 96>}, {pipeline_mode = #tpu.pipeline_mode<synchronous>, transform_indices = @transform_2, window_bounds = array<i64: 1, 96>}, {transform_indices = @transform_3, window_bounds = array<i64: 1, 4, 8, 8>}, {transform_indices = @transform_4, window_bounds = array<i64: 1, 4, 8, 8>}, {transform_indices = @transform_5, window_bounds = array<i64: 1, 4, 8, 8>}]} {
    %c0 = arith.constant 0 : index
    %c0_0 = arith.constant 0 : index
    %c0_1 = arith.constant 0 : index
    %0 = vector.load %arg2[%c0, %c0_0, %c0_1] : memref<1x8x32xf32, #tpu.memory_space<vmem>>, vector<1x8x32xf32>
    %1 = vector.shape_cast %0 : vector<1x8x32xf32> to vector<8x32xf32>
    %2 = arith.truncf %1 : vector<8x32xf32> to vector<8x32xbf16>
    %c0_2 = arith.constant 0 : index
    %c0_3 = arith.constant 0 : index
    %3 = vector.load %arg3[%c0_2, %c0_3] : memref<32x96xbf16, #tpu.memory_space<vmem>>, vector<32x96xbf16>
    %cst = arith.constant dense<0.000000e+00> : vector<8x96xf32>
    %4 = tpu.matmul %2, %3, %cst {dimension_numbers = #tpu.dot_dimension_numbers<[1], [0], [0], [1], [0, 0, 1, 1], [], []>} : vector<8x32xbf16>, vector<32x96xbf16>, vector<8x96xf32> -> vector<8x96xf32>
    %c0_4 = arith.constant 0 : index
    %c0_5 = arith.constant 0 : index
    %5 = vector.load %arg4[%c0_4, %c0_5] : memref<1x96xf32, #tpu.memory_space<vmem>>, vector<1x96xf32>
    %6 = vector.broadcast %5 : vector<1x96xf32> to vector<8x96xf32>
    %7 = arith.addf %4, %6 : vector<8x96xf32>
    %8 = vector.extract_strided_slice %7 {offsets = [0, 0], sizes = [8, 8], strides = [1, 1]} : vector<8x96xf32> to vector<8x8xf32>
    %9 = arith.truncf %8 : vector<8x8xf32> to vector<8x8xbf16>
    %c0_6 = arith.constant 0 : index
    %c0_7 = arith.constant 0 : index
    %c0_8 = arith.constant 0 : index
    %c0_9 = arith.constant 0 : index
    %10 = vector.load %arg5[%c0_6, %c0_7, %c0_8, %c0_9] : memref<1x4x8x8xbf16, #tpu.memory_space<vmem>>, vector<1x1x8x8xbf16>
    %11 = vector.shape_cast %10 : vector<1x1x8x8xbf16> to vector<8x8xbf16>
    %12 = vector.shape_cast %9 : vector<8x8xbf16> to vector<1x1x8x8xbf16>
    tpu.vector_store %arg5[%c0_6, %c0_7, %c0_8, %c0_9], %12 {strides = array<i32>} : memref<1x4x8x8xbf16, #tpu.memory_space<vmem>>, vector<1x1x8x8xbf16>,
    %13 = vector.extract_strided_slice %7 {offsets = [0, 32], sizes = [8, 8], strides = [1, 1]} : vector<8x96xf32> to vector<8x8xf32>
    %14 = arith.truncf %13 : vector<8x8xf32> to vector<8x8xbf16>
    %c0_10 = arith.constant 0 : index
    %c0_11 = arith.constant 0 : index
    %c0_12 = arith.constant 0 : index
    %c0_13 = arith.constant 0 : index
    %15 = vector.load %arg6[%c0_10, %c0_11, %c0_12, %c0_13] : memref<1x4x8x8xbf16, #tpu.memory_space<vmem>>, vector<1x1x8x8xbf16>
    %16 = vector.shape_cast %15 : vector<1x1x8x8xbf16> to vector<8x8xbf16>
    %17 = vector.shape_cast %14 : vector<8x8xbf16> to vector<1x1x8x8xbf16>
    tpu.vector_store %arg6[%c0_10, %c0_11, %c0_12, %c0_13], %17 {strides = array<i32>} : memref<1x4x8x8xbf16, #tpu.memory_space<vmem>>, vector<1x1x8x8xbf16>,
    %18 = vector.extract_strided_slice %7 {offsets = [0, 64], sizes = [8, 8], strides = [1, 1]} : vector<8x96xf32> to vector<8x8xf32>
    %19 = arith.truncf %18 : vector<8x8xf32> to vector<8x8xbf16>
    %c0_14 = arith.constant 0 : index
    %c0_15 = arith.constant 0 : index
    %c0_16 = arith.constant 0 : index
    %c0_17 = arith.constant 0 : index
    %20 = vector.load %arg7[%c0_14, %c0_15, %c0_16, %c0_17] : memref<1x4x8x8xbf16, #tpu.memory_space<vmem>>, vector<1x1x8x8xbf16>
    %21 = vector.shape_cast %20 : vector<1x1x8x8xbf16> to vector<8x8xbf16>
    %22 = vector.shape_cast %19 : vector<8x8xbf16> to vector<1x1x8x8xbf16>
    tpu.vector_store %arg7[%c0_14, %c0_15, %c0_16, %c0_17], %22 {strides = array<i32>} : memref<1x4x8x8xbf16, #tpu.memory_space<vmem>>, vector<1x1x8x8xbf16>,
    %23 = vector.extract_strided_slice %7 {offsets = [0, 8], sizes = [8, 8], strides = [1, 1]} : vector<8x96xf32> to vector<8x8xf32>
    %24 = arith.truncf %23 : vector<8x8xf32> to vector<8x8xbf16>
    %c0_18 = arith.constant 0 : index
    %c1 = arith.constant 1 : index
    %c0_19 = arith.constant 0 : index
    %c0_20 = arith.constant 0 : index
    %25 = vector.load %arg5[%c0_18, %c1, %c0_19, %c0_20] : memref<1x4x8x8xbf16, #tpu.memory_space<vmem>>, vector<1x1x8x8xbf16>
    %26 = vector.shape_cast %25 : vector<1x1x8x8xbf16> to vector<8x8xbf16>
    %27 = vector.shape_cast %24 : vector<8x8xbf16> to vector<1x1x8x8xbf16>
    tpu.vector_store %arg5[%c0_18, %c1, %c0_19, %c0_20], %27 {strides = array<i32>} : memref<1x4x8x8xbf16, #tpu.memory_space<vmem>>, vector<1x1x8x8xbf16>,
    %28 = vector.extract_strided_slice %7 {offsets = [0, 40], sizes = [8, 8], strides = [1, 1]} : vector<8x96xf32> to vector<8x8xf32>
    %29 = arith.truncf %28 : vector<8x8xf32> to vector<8x8xbf16>
    %c0_21 = arith.constant 0 : index
    %c1_22 = arith.constant 1 : index
    %c0_23 = arith.constant 0 : index
    %c0_24 = arith.constant 0 : index
    %30 = vector.load %arg6[%c0_21, %c1_22, %c0_23, %c0_24] : memref<1x4x8x8xbf16, #tpu.memory_space<vmem>>, vector<1x1x8x8xbf16>
    %31 = vector.shape_cast %30 : vector<1x1x8x8xbf16> to vector<8x8xbf16>
    %32 = vector.shape_cast %29 : vector<8x8xbf16> to vector<1x1x8x8xbf16>
    tpu.vector_store %arg6[%c0_21, %c1_22, %c0_23, %c0_24], %32 {strides = array<i32>} : memref<1x4x8x8xbf16, #tpu.memory_space<vmem>>, vector<1x1x8x8xbf16>,
    %33 = vector.extract_strided_slice %7 {offsets = [0, 72], sizes = [8, 8], strides = [1, 1]} : vector<8x96xf32> to vector<8x8xf32>
    %34 = arith.truncf %33 : vector<8x8xf32> to vector<8x8xbf16>
    %c0_25 = arith.constant 0 : index
    %c1_26 = arith.constant 1 : index
    %c0_27 = arith.constant 0 : index
    %c0_28 = arith.constant 0 : index
    %35 = vector.load %arg7[%c0_25, %c1_26, %c0_27, %c0_28] : memref<1x4x8x8xbf16, #tpu.memory_space<vmem>>, vector<1x1x8x8xbf16>
    %36 = vector.shape_cast %35 : vector<1x1x8x8xbf16> to vector<8x8xbf16>
    %37 = vector.shape_cast %34 : vector<8x8xbf16> to vector<1x1x8x8xbf16>
    tpu.vector_store %arg7[%c0_25, %c1_26, %c0_27, %c0_28], %37 {strides = array<i32>} : memref<1x4x8x8xbf16, #tpu.memory_space<vmem>>, vector<1x1x8x8xbf16>,
    %38 = vector.extract_strided_slice %7 {offsets = [0, 16], sizes = [8, 8], strides = [1, 1]} : vector<8x96xf32> to vector<8x8xf32>
    %39 = arith.truncf %38 : vector<8x8xf32> to vector<8x8xbf16>
    %c0_29 = arith.constant 0 : index
    %c2 = arith.constant 2 : index
    %c0_30 = arith.constant 0 : index
    %c0_31 = arith.constant 0 : index
    %40 = vector.load %arg5[%c0_29, %c2, %c0_30, %c0_31] : memref<1x4x8x8xbf16, #tpu.memory_space<vmem>>, vector<1x1x8x8xbf16>
    %41 = vector.shape_cast %40 : vector<1x1x8x8xbf16> to vector<8x8xbf16>
    %42 = vector.shape_cast %39 : vector<8x8xbf16> to vector<1x1x8x8xbf16>
    tpu.vector_store %arg5[%c0_29, %c2, %c0_30, %c0_31], %42 {strides = array<i32>} : memref<1x4x8x8xbf16, #tpu.memory_space<vmem>>, vector<1x1x8x8xbf16>,
    %43 = vector.extract_strided_slice %7 {offsets = [0, 48], sizes = [8, 8], strides = [1, 1]} : vector<8x96xf32> to vector<8x8xf32>
    %44 = arith.truncf %43 : vector<8x8xf32> to vector<8x8xbf16>
    %c0_32 = arith.constant 0 : index
    %c2_33 = arith.constant 2 : index
    %c0_34 = arith.constant 0 : index
    %c0_35 = arith.constant 0 : index
    %45 = vector.load %arg6[%c0_32, %c2_33, %c0_34, %c0_35] : memref<1x4x8x8xbf16, #tpu.memory_space<vmem>>, vector<1x1x8x8xbf16>
    %46 = vector.shape_cast %45 : vector<1x1x8x8xbf16> to vector<8x8xbf16>
    %47 = vector.shape_cast %44 : vector<8x8xbf16> to vector<1x1x8x8xbf16>
    tpu.vector_store %arg6[%c0_32, %c2_33, %c0_34, %c0_35], %47 {strides = array<i32>} : memref<1x4x8x8xbf16, #tpu.memory_space<vmem>>, vector<1x1x8x8xbf16>,
    %48 = vector.extract_strided_slice %7 {offsets = [0, 80], sizes = [8, 8], strides = [1, 1]} : vector<8x96xf32> to vector<8x8xf32>
    %49 = arith.truncf %48 : vector<8x8xf32> to vector<8x8xbf16>
    %c0_36 = arith.constant 0 : index
    %c2_37 = arith.constant 2 : index
    %c0_38 = arith.constant 0 : index
    %c0_39 = arith.constant 0 : index
    %50 = vector.load %arg7[%c0_36, %c2_37, %c0_38, %c0_39] : memref<1x4x8x8xbf16, #tpu.memory_space<vmem>>, vector<1x1x8x8xbf16>
    %51 = vector.shape_cast %50 : vector<1x1x8x8xbf16> to vector<8x8xbf16>
    %52 = vector.shape_cast %49 : vector<8x8xbf16> to vector<1x1x8x8xbf16>
    tpu.vector_store %arg7[%c0_36, %c2_37, %c0_38, %c0_39], %52 {strides = array<i32>} : memref<1x4x8x8xbf16, #tpu.memory_space<vmem>>, vector<1x1x8x8xbf16>,
    %53 = vector.extract_strided_slice %7 {offsets = [0, 24], sizes = [8, 8], strides = [1, 1]} : vector<8x96xf32> to vector<8x8xf32>
    %54 = arith.truncf %53 : vector<8x8xf32> to vector<8x8xbf16>
    %c0_40 = arith.constant 0 : index
    %c3 = arith.constant 3 : index
    %c0_41 = arith.constant 0 : index
    %c0_42 = arith.constant 0 : index
    %55 = vector.load %arg5[%c0_40, %c3, %c0_41, %c0_42] : memref<1x4x8x8xbf16, #tpu.memory_space<vmem>>, vector<1x1x8x8xbf16>
    %56 = vector.shape_cast %55 : vector<1x1x8x8xbf16> to vector<8x8xbf16>
    %57 = vector.shape_cast %54 : vector<8x8xbf16> to vector<1x1x8x8xbf16>
    tpu.vector_store %arg5[%c0_40, %c3, %c0_41, %c0_42], %57 {strides = array<i32>} : memref<1x4x8x8xbf16, #tpu.memory_space<vmem>>, vector<1x1x8x8xbf16>,
    %58 = vector.extract_strided_slice %7 {offsets = [0, 56], sizes = [8, 8], strides = [1, 1]} : vector<8x96xf32> to vector<8x8xf32>
    %59 = arith.truncf %58 : vector<8x8xf32> to vector<8x8xbf16>
    %c0_43 = arith.constant 0 : index
    %c3_44 = arith.constant 3 : index
    %c0_45 = arith.constant 0 : index
    %c0_46 = arith.constant 0 : index
    %60 = vector.load %arg6[%c0_43, %c3_44, %c0_45, %c0_46] : memref<1x4x8x8xbf16, #tpu.memory_space<vmem>>, vector<1x1x8x8xbf16>
    %61 = vector.shape_cast %60 : vector<1x1x8x8xbf16> to vector<8x8xbf16>
    %62 = vector.shape_cast %59 : vector<8x8xbf16> to vector<1x1x8x8xbf16>
    tpu.vector_store %arg6[%c0_43, %c3_44, %c0_45, %c0_46], %62 {strides = array<i32>} : memref<1x4x8x8xbf16, #tpu.memory_space<vmem>>, vector<1x1x8x8xbf16>,
    %63 = vector.extract_strided_slice %7 {offsets = [0, 88], sizes = [8, 8], strides = [1, 1]} : vector<8x96xf32> to vector<8x8xf32>
    %64 = arith.truncf %63 : vector<8x8xf32> to vector<8x8xbf16>
    %c0_47 = arith.constant 0 : index
    %c3_48 = arith.constant 3 : index
    %c0_49 = arith.constant 0 : index
    %c0_50 = arith.constant 0 : index
    %65 = vector.load %arg7[%c0_47, %c3_48, %c0_49, %c0_50] : memref<1x4x8x8xbf16, #tpu.memory_space<vmem>>, vector<1x1x8x8xbf16>
    %66 = vector.shape_cast %65 : vector<1x1x8x8xbf16> to vector<8x8xbf16>
    %67 = vector.shape_cast %64 : vector<8x8xbf16> to vector<1x1x8x8xbf16>
    tpu.vector_store %arg7[%c0_47, %c3_48, %c0_49, %c0_50], %67 {strides = array<i32>} : memref<1x4x8x8xbf16, #tpu.memory_space<vmem>>, vector<1x1x8x8xbf16>,
    return
  }
  func.func @transform_0(%arg0: i32, %arg1: i32) -> (i32, i32, i32) {
    %c0_i32 = arith.constant 0 : i32
    %c0_i32_0 = arith.constant 0 : i32
    return %arg0, %arg1, %c0_i32 : i32, i32, i32
  }
  func.func @transform_1(%arg0: i32, %arg1: i32) -> (i32, i32) {
    %c0_i32 = arith.constant 0 : i32
    %c0_i32_0 = arith.constant 0 : i32
    %c0_i32_1 = arith.constant 0 : i32
    return %c0_i32, %c0_i32_0 : i32, i32
  }
  func.func @transform_2(%arg0: i32, %arg1: i32) -> (i32, i32) {
    %c0_i32 = arith.constant 0 : i32
    %c0_i32_0 = arith.constant 0 : i32
    %c0_i32_1 = arith.constant 0 : i32
    return %c0_i32, %c0_i32_0 : i32, i32
  }
  func.func @transform_3(%arg0: i32, %arg1: i32) -> (i32, i32, i32, i32) {
    %c0_i32 = arith.constant 0 : i32
    %c0_i32_0 = arith.constant 0 : i32
    %c0_i32_1 = arith.constant 0 : i32
    return %arg0, %c0_i32, %arg1, %c0_i32_0 : i32, i32, i32, i32
  }
  func.func @transform_4(%arg0: i32, %arg1: i32) -> (i32, i32, i32, i32) {
    %c0_i32 = arith.constant 0 : i32
    %c0_i32_0 = arith.constant 0 : i32
    %c0_i32_1 = arith.constant 0 : i32
    return %arg0, %c0_i32, %arg1, %c0_i32_0 : i32, i32, i32, i32
  }
  func.func @transform_5(%arg0: i32, %arg1: i32) -> (i32, i32, i32, i32) {
    %c0_i32 = arith.constant 0 : i32
    %c0_i32_0 = arith.constant 0 : i32
    %c0_i32_1 = arith.constant 0 : i32
    return %arg0, %c0_i32, %arg1, %c0_i32_0 : i32, i32, i32, i32
  }
}

module attributes {stable_mosaic.version = 11 : i64} {
  func.func @attn_ffn_kernel(%arg0: i32, %arg1: i32, %arg2: memref<1x8x32xf32, #tpu.memory_space<vmem>>, %arg3: memref<1x4x8x8xbf16, #tpu.memory_space<vmem>>, %arg4: memref<1x4x8x8xbf16, #tpu.memory_space<vmem>>, %arg5: memref<1x4x8x8xbf16, #tpu.memory_space<vmem>>, %arg6: memref<4x8x32xbf16, #tpu.memory_space<vmem>>, %arg7: memref<1x32xf32, #tpu.memory_space<vmem>>, %arg8: memref<32x64xbf16, #tpu.memory_space<vmem>>, %arg9: memref<1x64xf32, #tpu.memory_space<vmem>>, %arg10: memref<64x32xbf16, #tpu.memory_space<vmem>>, %arg11: memref<1x32xf32, #tpu.memory_space<vmem>>, %arg12: memref<1x32xf32, #tpu.memory_space<vmem>>, %arg13: memref<1x32xf32, #tpu.memory_space<vmem>>, %arg14: memref<1x32xf32, #tpu.memory_space<vmem>>, %arg15: memref<1x32xf32, #tpu.memory_space<vmem>>, %arg16: memref<1x8x32xf32, #tpu.memory_space<vmem>>) attributes {dimension_semantics = [#tpu.dimension_semantics<parallel>, #tpu.dimension_semantics<parallel>], iteration_bounds = array<i64: 2, 1>, scalar_prefetch = 0 : i64, scratch_operands = 0 : i64, tpu.core_type = #tpu.core_type<tc>, window_params = [{transform_indices = @transform_0, window_bounds = array<i64: 1, 8, 32>}, {transform_indices = @transform_1, window_bounds = array<i64: 1, 4, 8, 8>}, {transform_indices = @transform_2, window_bounds = array<i64: 1, 4, 8, 8>}, {transform_indices = @transform_3, window_bounds = array<i64: 1, 4, 8, 8>}, {pipeline_mode = #tpu.pipeline_mode<synchronous>, transform_indices = @transform_4, window_bounds = array<i64: 4, 8, 32>}, {pipeline_mode = #tpu.pipeline_mode<synchronous>, transform_indices = @transform_5, window_bounds = array<i64: 1, 32>}, {pipeline_mode = #tpu.pipeline_mode<synchronous>, transform_indices = @transform_6, window_bounds = array<i64: 32, 64>}, {pipeline_mode = #tpu.pipeline_mode<synchronous>, transform_indices = @transform_7, window_bounds = array<i64: 1, 64>}, {pipeline_mode = #tpu.pipeline_mode<synchronous>, transform_indices = @transform_8, window_bounds = array<i64: 64, 32>}, {pipeline_mode = #tpu.pipeline_mode<synchronous>, transform_indices = @transform_9, window_bounds = array<i64: 1, 32>}, {pipeline_mode = #tpu.pipeline_mode<synchronous>, transform_indices = @transform_10, window_bounds = array<i64: 1, 32>}, {pipeline_mode = #tpu.pipeline_mode<synchronous>, transform_indices = @transform_11, window_bounds = array<i64: 1, 32>}, {pipeline_mode = #tpu.pipeline_mode<synchronous>, transform_indices = @transform_12, window_bounds = array<i64: 1, 32>}, {pipeline_mode = #tpu.pipeline_mode<synchronous>, transform_indices = @transform_13, window_bounds = array<i64: 1, 32>}, {transform_indices = @transform_14, window_bounds = array<i64: 1, 8, 32>}]} {
    %c0 = arith.constant 0 : index
    %c0_0 = arith.constant 0 : index
    %c0_1 = arith.constant 0 : index
    %0 = vector.load %arg2[%c0, %c0_0, %c0_1] : memref<1x8x32xf32, #tpu.memory_space<vmem>>, vector<1x8x32xf32>
    %1 = vector.shape_cast %0 : vector<1x8x32xf32> to vector<8x32xf32>
    %c0_2 = arith.constant 0 : index
    %c0_3 = arith.constant 0 : index
    %c0_4 = arith.constant 0 : index
    %c0_5 = arith.constant 0 : index
    %2 = vector.load %arg3[%c0_2, %c0_3, %c0_4, %c0_5] : memref<1x4x8x8xbf16, #tpu.memory_space<vmem>>, vector<1x4x8x8xbf16>
    %3 = vector.shape_cast %2 : vector<1x4x8x8xbf16> to vector<4x8x8xbf16>
    %c0_6 = arith.constant 0 : index
    %c0_7 = arith.constant 0 : index
    %c0_8 = arith.constant 0 : index
    %c0_9 = arith.constant 0 : index
    %4 = vector.load %arg4[%c0_6, %c0_7, %c0_8, %c0_9] : memref<1x4x8x8xbf16, #tpu.memory_space<vmem>>, vector<1x4x8x8xbf16>
    %5 = vector.shape_cast %4 : vector<1x4x8x8xbf16> to vector<4x8x8xbf16>
    %c0_10 = arith.constant 0 : index
    %c0_11 = arith.constant 0 : index
    %c0_12 = arith.constant 0 : index
    %c0_13 = arith.constant 0 : index
    %6 = vector.load %arg5[%c0_10, %c0_11, %c0_12, %c0_13] : memref<1x4x8x8xbf16, #tpu.memory_space<vmem>>, vector<1x4x8x8xbf16>
    %7 = vector.shape_cast %6 : vector<1x4x8x8xbf16> to vector<4x8x8xbf16>
    "tpu.trace_start"() <{level = 10 : i32, message = "hqd,hkd->hqk"}> : () -> ()
    %cst = arith.constant dense<0.000000e+00> : vector<4x8x8xf32>
    %8 = tpu.matmul %3, %5, %cst {dimension_numbers = #tpu.dot_dimension_numbers<[2], [2], [1], [1], [0, 0, 0, 1, 1, 1], [0], [0]>} : vector<4x8x8xbf16>, vector<4x8x8xbf16>, vector<4x8x8xf32> -> vector<4x8x8xf32>
    "tpu.trace_stop"() : () -> ()
    %cst_14 = arith.constant dense<0xFF800000> : vector<4x8xf32>
    %9 = vector.multi_reduction <maximumf>, %8, %cst_14 [2] : vector<4x8x8xf32> to vector<4x8xf32>
    %10 = vector.shape_cast %9 : vector<4x8xf32> to vector<4x8x1xf32>
    %11 = vector.broadcast %10 : vector<4x8x1xf32> to vector<4x8x8xf32>
    %12 = arith.subf %8, %11 : vector<4x8x8xf32>
    %13 = math.exp %12 : vector<4x8x8xf32>
    %cst_15 = arith.constant dense<0.000000e+00> : vector<4x8xf32>
    %14 = vector.multi_reduction <add>, %13, %cst_15 [2] : vector<4x8x8xf32> to vector<4x8xf32>
    %15 = vector.shape_cast %14 : vector<4x8xf32> to vector<4x8x1xf32>
    %16 = tpu.reciprocal %15 {approx = true} : vector<4x8x1xf32> -> vector<4x8x1xf32>
    %17 = vector.broadcast %16 : vector<4x8x1xf32> to vector<4x8x8xf32>
    %18 = arith.mulf %13, %17 : vector<4x8x8xf32>
    %19 = arith.truncf %18 : vector<4x8x8xf32> to vector<4x8x8xbf16>
    "tpu.trace_start"() <{level = 10 : i32, message = "hqk,hkd->hqd"}> : () -> ()
    %cst_16 = arith.constant dense<0.000000e+00> : vector<4x8x8xf32>
    %20 = tpu.matmul %19, %7, %cst_16 {dimension_numbers = #tpu.dot_dimension_numbers<[2], [1], [1], [2], [0, 0, 0, 1, 1, 2], [0], [0]>} : vector<4x8x8xbf16>, vector<4x8x8xbf16>, vector<4x8x8xf32> -> vector<4x8x8xf32>
    "tpu.trace_stop"() : () -> ()
    %21 = vector.extract_strided_slice %20 {offsets = [0, 0, 0], sizes = [1, 8, 8], strides = [1, 1, 1]} : vector<4x8x8xf32> to vector<1x8x8xf32>
    %22 = vector.shape_cast %21 : vector<1x8x8xf32> to vector<8x8xf32>
    %23 = arith.truncf %22 : vector<8x8xf32> to vector<8x8xbf16>
    %c0_17 = arith.constant 0 : index
    %c0_18 = arith.constant 0 : index
    %c0_19 = arith.constant 0 : index
    %24 = vector.load %arg6[%c0_17, %c0_18, %c0_19] : memref<4x8x32xbf16, #tpu.memory_space<vmem>>, vector<1x8x32xbf16>
    %25 = vector.shape_cast %24 : vector<1x8x32xbf16> to vector<8x32xbf16>
    %cst_20 = arith.constant dense<0.000000e+00> : vector<8x32xf32>
    %26 = tpu.matmul %23, %25, %cst_20 {dimension_numbers = #tpu.dot_dimension_numbers<[1], [0], [0], [1], [0, 0, 1, 1], [], []>} : vector<8x8xbf16>, vector<8x32xbf16>, vector<8x32xf32> -> vector<8x32xf32>
    %27 = vector.extract_strided_slice %20 {offsets = [1, 0, 0], sizes = [1, 8, 8], strides = [1, 1, 1]} : vector<4x8x8xf32> to vector<1x8x8xf32>
    %28 = vector.shape_cast %27 : vector<1x8x8xf32> to vector<8x8xf32>
    %29 = arith.truncf %28 : vector<8x8xf32> to vector<8x8xbf16>
    %c1 = arith.constant 1 : index
    %c0_21 = arith.constant 0 : index
    %c0_22 = arith.constant 0 : index
    %30 = vector.load %arg6[%c1, %c0_21, %c0_22] : memref<4x8x32xbf16, #tpu.memory_space<vmem>>, vector<1x8x32xbf16>
    %31 = vector.shape_cast %30 : vector<1x8x32xbf16> to vector<8x32xbf16>
    %cst_23 = arith.constant dense<0.000000e+00> : vector<8x32xf32>
    %32 = tpu.matmul %29, %31, %cst_23 {dimension_numbers = #tpu.dot_dimension_numbers<[1], [0], [0], [1], [0, 0, 1, 1], [], []>} : vector<8x8xbf16>, vector<8x32xbf16>, vector<8x32xf32> -> vector<8x32xf32>
    %33 = arith.addf %26, %32 : vector<8x32xf32>
    %34 = vector.extract_strided_slice %20 {offsets = [2, 0, 0], sizes = [1, 8, 8], strides = [1, 1, 1]} : vector<4x8x8xf32> to vector<1x8x8xf32>
    %35 = vector.shape_cast %34 : vector<1x8x8xf32> to vector<8x8xf32>
    %36 = arith.truncf %35 : vector<8x8xf32> to vector<8x8xbf16>
    %c2 = arith.constant 2 : index
    %c0_24 = arith.constant 0 : index
    %c0_25 = arith.constant 0 : index
    %37 = vector.load %arg6[%c2, %c0_24, %c0_25] : memref<4x8x32xbf16, #tpu.memory_space<vmem>>, vector<1x8x32xbf16>
    %38 = vector.shape_cast %37 : vector<1x8x32xbf16> to vector<8x32xbf16>
    %cst_26 = arith.constant dense<0.000000e+00> : vector<8x32xf32>
    %39 = tpu.matmul %36, %38, %cst_26 {dimension_numbers = #tpu.dot_dimension_numbers<[1], [0], [0], [1], [0, 0, 1, 1], [], []>} : vector<8x8xbf16>, vector<8x32xbf16>, vector<8x32xf32> -> vector<8x32xf32>
    %40 = arith.addf %33, %39 : vector<8x32xf32>
    %41 = vector.extract_strided_slice %20 {offsets = [3, 0, 0], sizes = [1, 8, 8], strides = [1, 1, 1]} : vector<4x8x8xf32> to vector<1x8x8xf32>
    %42 = vector.shape_cast %41 : vector<1x8x8xf32> to vector<8x8xf32>
    %43 = arith.truncf %42 : vector<8x8xf32> to vector<8x8xbf16>
    %c3 = arith.constant 3 : index
    %c0_27 = arith.constant 0 : index
    %c0_28 = arith.constant 0 : index
    %44 = vector.load %arg6[%c3, %c0_27, %c0_28] : memref<4x8x32xbf16, #tpu.memory_space<vmem>>, vector<1x8x32xbf16>
    %45 = vector.shape_cast %44 : vector<1x8x32xbf16> to vector<8x32xbf16>
    %cst_29 = arith.constant dense<0.000000e+00> : vector<8x32xf32>
    %46 = tpu.matmul %43, %45, %cst_29 {dimension_numbers = #tpu.dot_dimension_numbers<[1], [0], [0], [1], [0, 0, 1, 1], [], []>} : vector<8x8xbf16>, vector<8x32xbf16>, vector<8x32xf32> -> vector<8x32xf32>
    %47 = arith.addf %40, %46 : vector<8x32xf32>
    %c0_30 = arith.constant 0 : index
    %c0_31 = arith.constant 0 : index
    %48 = vector.load %arg7[%c0_30, %c0_31] : memref<1x32xf32, #tpu.memory_space<vmem>>, vector<1x32xf32>
    %49 = vector.broadcast %48 : vector<1x32xf32> to vector<8x32xf32>
    %50 = arith.addf %47, %49 : vector<8x32xf32>
    %51 = arith.addf %1, %50 : vector<8x32xf32>
    %c0_32 = arith.constant 0 : index
    %c0_33 = arith.constant 0 : index
    %52 = vector.load %arg12[%c0_32, %c0_33] : memref<1x32xf32, #tpu.memory_space<vmem>>, vector<1x32xf32>
    %c0_34 = arith.constant 0 : index
    %c0_35 = arith.constant 0 : index
    %53 = vector.load %arg13[%c0_34, %c0_35] : memref<1x32xf32, #tpu.memory_space<vmem>>, vector<1x32xf32>
    %cst_36 = arith.constant dense<0.000000e+00> : vector<8xf32>
    %54 = vector.multi_reduction <add>, %51, %cst_36 [1] : vector<8x32xf32> to vector<8xf32>
    %55 = vector.shape_cast %54 : vector<8xf32> to vector<8x1xf32>
    %cst_37 = arith.constant 3.200000e+01 : f32
    %56 = vector.broadcast %cst_37 : f32 to vector<8x1xf32>
    %57 = arith.divf %55, %56 : vector<8x1xf32>
    %58 = vector.broadcast %57 : vector<8x1xf32> to vector<8x32xf32>
    %59 = arith.subf %51, %58 : vector<8x32xf32>
    %60 = vector.broadcast %57 : vector<8x1xf32> to vector<8x32xf32>
    %61 = arith.subf %51, %60 : vector<8x32xf32>
    %62 = arith.mulf %59, %61 : vector<8x32xf32>
    %cst_38 = arith.constant dense<0.000000e+00> : vector<8xf32>
    %63 = vector.multi_reduction <add>, %62, %cst_38 [1] : vector<8x32xf32> to vector<8xf32>
    %64 = vector.shape_cast %63 : vector<8xf32> to vector<8x1xf32>
    %cst_39 = arith.constant 3.200000e+01 : f32
    %65 = vector.broadcast %cst_39 : f32 to vector<8x1xf32>
    %66 = arith.divf %64, %65 : vector<8x1xf32>
    %67 = vector.broadcast %57 : vector<8x1xf32> to vector<8x32xf32>
    %68 = arith.subf %51, %67 : vector<8x32xf32>
    %cst_40 = arith.constant 9.99999974E-6 : f32
    %69 = vector.broadcast %cst_40 : f32 to vector<8x1xf32>
    %70 = arith.addf %66, %69 : vector<8x1xf32>
    %71 = math.rsqrt %70 : vector<8x1xf32>
    %72 = vector.broadcast %71 : vector<8x1xf32> to vector<8x32xf32>
    %73 = arith.mulf %68, %72 : vector<8x32xf32>
    %74 = vector.broadcast %52 : vector<1x32xf32> to vector<8x32xf32>
    %75 = arith.mulf %73, %74 : vector<8x32xf32>
    %76 = vector.broadcast %53 : vector<1x32xf32> to vector<8x32xf32>
    %77 = arith.addf %75, %76 : vector<8x32xf32>
    %78 = arith.truncf %77 : vector<8x32xf32> to vector<8x32xbf16>
    %c0_41 = arith.constant 0 : index
    %c0_42 = arith.constant 0 : index
    %79 = vector.load %arg8[%c0_41, %c0_42] : memref<32x64xbf16, #tpu.memory_space<vmem>>, vector<32x64xbf16>
    %cst_43 = arith.constant dense<0.000000e+00> : vector<8x64xf32>
    %80 = tpu.matmul %78, %79, %cst_43 {dimension_numbers = #tpu.dot_dimension_numbers<[1], [0], [0], [1], [0, 0, 1, 1], [], []>} : vector<8x32xbf16>, vector<32x64xbf16>, vector<8x64xf32> -> vector<8x64xf32>
    %c0_44 = arith.constant 0 : index
    %c0_45 = arith.constant 0 : index
    %81 = vector.load %arg9[%c0_44, %c0_45] : memref<1x64xf32, #tpu.memory_space<vmem>>, vector<1x64xf32>
    %82 = vector.broadcast %81 : vector<1x64xf32> to vector<8x64xf32>
    %83 = arith.addf %80, %82 : vector<8x64xf32>
    %cst_46 = arith.constant 0.000000e+00 : f32
    %84 = vector.broadcast %cst_46 : f32 to vector<8x64xf32>
    %85 = arith.maximumf %83, %84 : vector<8x64xf32>
    %86 = arith.truncf %85 : vector<8x64xf32> to vector<8x64xbf16>
    %c0_47 = arith.constant 0 : index
    %c0_48 = arith.constant 0 : index
    %87 = vector.load %arg10[%c0_47, %c0_48] : memref<64x32xbf16, #tpu.memory_space<vmem>>, vector<64x32xbf16>
    %cst_49 = arith.constant dense<0.000000e+00> : vector<8x32xf32>
    %88 = tpu.matmul %86, %87, %cst_49 {dimension_numbers = #tpu.dot_dimension_numbers<[1], [0], [0], [1], [0, 0, 1, 1], [], []>} : vector<8x64xbf16>, vector<64x32xbf16>, vector<8x32xf32> -> vector<8x32xf32>
    %c0_50 = arith.constant 0 : index
    %c0_51 = arith.constant 0 : index
    %89 = vector.load %arg11[%c0_50, %c0_51] : memref<1x32xf32, #tpu.memory_space<vmem>>, vector<1x32xf32>
    %90 = vector.broadcast %89 : vector<1x32xf32> to vector<8x32xf32>
    %91 = arith.addf %88, %90 : vector<8x32xf32>
    %92 = arith.addf %77, %91 : vector<8x32xf32>
    %c0_52 = arith.constant 0 : index
    %c0_53 = arith.constant 0 : index
    %93 = vector.load %arg14[%c0_52, %c0_53] : memref<1x32xf32, #tpu.memory_space<vmem>>, vector<1x32xf32>
    %c0_54 = arith.constant 0 : index
    %c0_55 = arith.constant 0 : index
    %94 = vector.load %arg15[%c0_54, %c0_55] : memref<1x32xf32, #tpu.memory_space<vmem>>, vector<1x32xf32>
    %cst_56 = arith.constant dense<0.000000e+00> : vector<8xf32>
    %95 = vector.multi_reduction <add>, %92, %cst_56 [1] : vector<8x32xf32> to vector<8xf32>
    %96 = vector.shape_cast %95 : vector<8xf32> to vector<8x1xf32>
    %cst_57 = arith.constant 3.200000e+01 : f32
    %97 = vector.broadcast %cst_57 : f32 to vector<8x1xf32>
    %98 = arith.divf %96, %97 : vector<8x1xf32>
    %99 = vector.broadcast %98 : vector<8x1xf32> to vector<8x32xf32>
    %100 = arith.subf %92, %99 : vector<8x32xf32>
    %101 = vector.broadcast %98 : vector<8x1xf32> to vector<8x32xf32>
    %102 = arith.subf %92, %101 : vector<8x32xf32>
    %103 = arith.mulf %100, %102 : vector<8x32xf32>
    %cst_58 = arith.constant dense<0.000000e+00> : vector<8xf32>
    %104 = vector.multi_reduction <add>, %103, %cst_58 [1] : vector<8x32xf32> to vector<8xf32>
    %105 = vector.shape_cast %104 : vector<8xf32> to vector<8x1xf32>
    %cst_59 = arith.constant 3.200000e+01 : f32
    %106 = vector.broadcast %cst_59 : f32 to vector<8x1xf32>
    %107 = arith.divf %105, %106 : vector<8x1xf32>
    %108 = vector.broadcast %98 : vector<8x1xf32> to vector<8x32xf32>
    %109 = arith.subf %92, %108 : vector<8x32xf32>
    %cst_60 = arith.constant 9.99999974E-6 : f32
    %110 = vector.broadcast %cst_60 : f32 to vector<8x1xf32>
    %111 = arith.addf %107, %110 : vector<8x1xf32>
    %112 = math.rsqrt %111 : vector<8x1xf32>
    %113 = vector.broadcast %112 : vector<8x1xf32> to vector<8x32xf32>
    %114 = arith.mulf %109, %113 : vector<8x32xf32>
    %115 = vector.broadcast %93 : vector<1x32xf32> to vector<8x32xf32>
    %116 = arith.mulf %114, %115 : vector<8x32xf32>
    %117 = vector.broadcast %94 : vector<1x32xf32> to vector<8x32xf32>
    %118 = arith.addf %116, %117 : vector<8x32xf32>
    %c0_61 = arith.constant 0 : index
    %c0_62 = arith.constant 0 : index
    %c0_63 = arith.constant 0 : index
    %119 = vector.load %arg16[%c0_61, %c0_62, %c0_63] : memref<1x8x32xf32, #tpu.memory_space<vmem>>, vector<1x8x32xf32>
    %120 = vector.shape_cast %119 : vector<1x8x32xf32> to vector<8x32xf32>
    %121 = vector.shape_cast %118 : vector<8x32xf32> to vector<1x8x32xf32>
    tpu.vector_store %arg16[%c0_61, %c0_62, %c0_63], %121 {strides = array<i32>} : memref<1x8x32xf32, #tpu.memory_space<vmem>>, vector<1x8x32xf32>,
    return
  }
  func.func @transform_0(%arg0: i32, %arg1: i32) -> (i32, i32, i32) {
    %c0_i32 = arith.constant 0 : i32
    %c0_i32_0 = arith.constant 0 : i32
    return %arg0, %arg1, %c0_i32 : i32, i32, i32
  }
  func.func @transform_1(%arg0: i32, %arg1: i32) -> (i32, i32, i32, i32) {
    %c0_i32 = arith.constant 0 : i32
    %c0_i32_0 = arith.constant 0 : i32
    %c0_i32_1 = arith.constant 0 : i32
    return %arg0, %c0_i32, %arg1, %c0_i32_0 : i32, i32, i32, i32
  }
  func.func @transform_2(%arg0: i32, %arg1: i32) -> (i32, i32, i32, i32) {
    %c0_i32 = arith.constant 0 : i32
    %c0_i32_0 = arith.constant 0 : i32
    %c0_i32_1 = arith.constant 0 : i32
    %c0_i32_2 = arith.constant 0 : i32
    return %arg0, %c0_i32, %c0_i32_0, %c0_i32_1 : i32, i32, i32, i32
  }
  func.func @transform_3(%arg0: i32, %arg1: i32) -> (i32, i32, i32, i32) {
    %c0_i32 = arith.constant 0 : i32
    %c0_i32_0 = arith.constant 0 : i32
    %c0_i32_1 = arith.constant 0 : i32
    %c0_i32_2 = arith.constant 0 : i32
    return %arg0, %c0_i32, %c0_i32_0, %c0_i32_1 : i32, i32, i32, i32
  }
  func.func @transform_4(%arg0: i32, %arg1: i32) -> (i32, i32, i32) {
    %c0_i32 = arith.constant 0 : i32
    %c0_i32_0 = arith.constant 0 : i32
    %c0_i32_1 = arith.constant 0 : i32
    %c0_i32_2 = arith.constant 0 : i32
    return %c0_i32, %c0_i32_0, %c0_i32_1 : i32, i32, i32
  }
  func.func @transform_5(%arg0: i32, %arg1: i32) -> (i32, i32) {
    %c0_i32 = arith.constant 0 : i32
    %c0_i32_0 = arith.constant 0 : i32
    %c0_i32_1 = arith.constant 0 : i32
    return %c0_i32, %c0_i32_0 : i32, i32
  }
  func.func @transform_6(%arg0: i32, %arg1: i32) -> (i32, i32) {
    %c0_i32 = arith.constant 0 : i32
    %c0_i32_0 = arith.constant 0 : i32
    %c0_i32_1 = arith.constant 0 : i32
    return %c0_i32, %c0_i32_0 : i32, i32
  }
  func.func @transform_7(%arg0: i32, %arg1: i32) -> (i32, i32) {
    %c0_i32 = arith.constant 0 : i32
    %c0_i32_0 = arith.constant 0 : i32
    %c0_i32_1 = arith.constant 0 : i32
    return %c0_i32, %c0_i32_0 : i32, i32
  }
  func.func @transform_8(%arg0: i32, %arg1: i32) -> (i32, i32) {
    %c0_i32 = arith.constant 0 : i32
    %c0_i32_0 = arith.constant 0 : i32
    %c0_i32_1 = arith.constant 0 : i32
    return %c0_i32, %c0_i32_0 : i32, i32
  }
  func.func @transform_9(%arg0: i32, %arg1: i32) -> (i32, i32) {
    %c0_i32 = arith.constant 0 : i32
    %c0_i32_0 = arith.constant 0 : i32
    %c0_i32_1 = arith.constant 0 : i32
    return %c0_i32, %c0_i32_0 : i32, i32
  }
  func.func @transform_10(%arg0: i32, %arg1: i32) -> (i32, i32) {
    %c0_i32 = arith.constant 0 : i32
    %c0_i32_0 = arith.constant 0 : i32
    %c0_i32_1 = arith.constant 0 : i32
    return %c0_i32, %c0_i32_0 : i32, i32
  }
  func.func @transform_11(%arg0: i32, %arg1: i32) -> (i32, i32) {
    %c0_i32 = arith.constant 0 : i32
    %c0_i32_0 = arith.constant 0 : i32
    %c0_i32_1 = arith.constant 0 : i32
    return %c0_i32, %c0_i32_0 : i32, i32
  }
  func.func @transform_12(%arg0: i32, %arg1: i32) -> (i32, i32) {
    %c0_i32 = arith.constant 0 : i32
    %c0_i32_0 = arith.constant 0 : i32
    %c0_i32_1 = arith.constant 0 : i32
    return %c0_i32, %c0_i32_0 : i32, i32
  }
  func.func @transform_13(%arg0: i32, %arg1: i32) -> (i32, i32) {
    %c0_i32 = arith.constant 0 : i32
    %c0_i32_0 = arith.constant 0 : i32
    %c0_i32_1 = arith.constant 0 : i32
    return %c0_i32, %c0_i32_0 : i32, i32
  }
  func.func @transform_14(%arg0: i32, %arg1: i32) -> (i32, i32, i32) {
    %c0_i32 = arith.constant 0 : i32
    %c0_i32_0 = arith.constant 0 : i32
    return %arg0, %arg1, %c0_i32 : i32, i32, i32
  }
}

</mosaic_0001>

<bundles_post_ra>
// kernel: enhanced_transformer_forward.9
= control target key start
LH: loop header
LB: loop body
LE: loop exit
PB: predicated region body
PF: predicated region fallthrough
CT: control target
= control target key end

     0   :  { %v152_v1 = vmov 0.0   ;;  %vm153_vm0 = vmmov 0   ;;  %s204_s0 = inlined_call_operand.vmem [shape: f32[16,32], index: 0, kind: input, shape index: {}]   ;;  %s205_s1 = inlined_call_operand.vmem [shape: bf16[32,64], index: 1, kind: input, shape index: {}]   ;;  %s206_s2 = inlined_call_operand.vmem [shape: f32[1,64], index: 2, kind: input, shape index: {}]   ;;  %s207_s3 = inlined_call_operand.hbm [shape: f32[16,64], index: 3, kind: output, shape index: {}]  }
   0x1   :  { %v126_v0 = vld [vmem:[%s205_s1] sm:$0xff]   ;;  %113 = vmatprep.subr.bf16.mxu0 %v152_v1  ;;  %v127_v2 = vld [vmem:[%s205_s1 + $0x8] sm:$0xff]   ;;  %117 = vmatprep.mubr.msk.bf16.mxu0 %vm153_vm0, %v152_v1 }
   0x2   :  { %114 = vmatpush3.bf16.msra.mxu0 %v126_v0  ;;  %v16_v3 = vld [vmem:[%s204_s0] sm:$0xff]  ;;  %v17_v4 = vld [vmem:[%s204_s0 + $0x8] sm:$0xff] }
   0x3   :  { %115 = vmatprep.subr.bf16.mxu0 %v152_v1 }
   0x4   :  { %8 = vsyncpa [#allocation3], 0  ;;  %v18_v5 = vpack.c.bf16 %v17_v4, %v16_v3  ;;  %vm42_vm1 = vcmask 261120   ;;  %v106_v6 = vld [vmem:[%s206_s2] ss:$0 sm:$0xff]  ;;  %s154_s1 = smov [#allocation2]  }
   0x5   :  { %s95_s22 = sshll.u32 %s154_s1, 4  ;;  %vm87_vm2 = vcmask 523264   ;;  %s96_s22 = int_to_ptr.vmem [resolvable:$true] %s95_s22 }
   0x6   :  { %116 = vmatpush3.bf16.msra.mxu0 %v127_v2  ;;  %s128_s0 = scalar_lea.vmem %s96_s22, 256  ;;  %p133_p1 = scmp.lt.s32.totalorder %s96_s22, %s96_s22 }
   0x7   :  { %p129_p0 = scmp.ne.s32.totalorder %s96_s22, %s128_s0  ;;  %p134_p2 = scmp.lt.s32.totalorder %s128_s0, %s128_s0 }
   0x9   :  { %118 = vmatmul.mubr.msk.bf16.vlgmr.msra.gmra.mrb[0].mxu0 %vm42_vm1, %v18_v5  ;;  %p135_p3 = por %p134_p2, %p133_p1 }
   0xb   :  { %p136_p4 = pnand %p135_p3, %p129_p0 }
  0xdc   :  { %v80_v7 = vpop.f32.mrb[0].mxu0 }
  0xdd   :  { %v81_v8 = vadd.f32 %v106_v6, %v80_v7  ;;  %v119_v9 = vpop.f32.mrb[1].mxu0 }
  0xde   :  { %v83_v10 = vpop.f32.mrb[2].mxu0 }
  0xdf   :  { %88 = vst.msk [vmem:[#allocation2] sm:$0xff] %vm87_vm2, %v81_v8  ;;  %v84_v11 = vadd.f32 %v106_v6, %v83_v10  ;;  %v120_v12 = vpop.f32.mrb[3].mxu0 }
  0xe1   :  { %89 = vst.msk [vmem:[#allocation2 + $0x8] sm:$0xff] %vm87_vm2, %v84_v11 }
  0xe2   :  { %139 = shalt.err (!%p136_p4)
}
  0xe3   :  { %s140_s24 = scalar_lea.hbm %s207_s3, 256 }
  0xe4   :  { %p141_p5 = scmp.ne.s32.totalorder %s207_s3, %s140_s24  ;;  %p144_p6 = scmp.lt.u32.totalorder %s140_s24, %s207_s3 }
  0xe6   :  { %p146_p7 = pnand %p144_p6, %p141_p5 }
  0xe8   :  { %149 = shalt.err (!%p146_p7)
}
  0xe9   :  { %s155_s29 = smov 128   ;;  %s156_s30 = smov 8  }
  0xea   :  { %101 = dma.vmem_to_hbm [thread:$0]  %s96_s22, 256, %s207_s3, [#allocation3], %s155_s29, %s155_s29, %s156_s30  }
  0xeb   :  { %150 = dma.done.wait [#allocation3], 256  }
  0xec   :  { %151 = vsyncadd [#allocation3], 4294967040 }
  0xed   :  { %105 = vsyncpa [#allocation3], 1 }

// kernel: enhanced_transformer_forward.5
= control target key start
LH: loop header
LB: loop body
LE: loop exit
PB: predicated region body
PF: predicated region fallthrough
CT: control target
= control target key end

     0   :  { %s746_s18 = smov 0   ;;  %s748_s19 = smov 0   ;;  %s817_s0 = inlined_call_operand.vmem [shape: f32[2,8,32], index: 0, kind: input, shape index: {}]   ;;  %s818_s1 = inlined_call_operand.vmem [shape: bf16[32,96], index: 1, kind: input, shape index: {}]   ;;  %s819_s2 = inlined_call_operand.vmem [shape: f32[1,96], index: 2, kind: input, shape index: {}]   ;;  %s820_s3 = inlined_call_operand.vmem [shape: bf16[2,4,8,8], index: 3, kind: output, shape index: {0}]   ;;  %s821_s4 = inlined_call_operand.vmem [shape: bf16[2,4,8,8], index: 4, kind: output, shape index: {1}]   ;;  %s822_s5 = inlined_call_operand.vmem [shape: bf16[2,4,8,8], index: 5, kind: output, shape index: {2}]  }
   0x1   :  { %s750_s20 = smov 0  }
   0x2 LB: > { %s28_s21 = sadd.s32 1, %s697_s19  ;;  %p601_p0 = scmp.ge.s32.totalorder %s701_s20, 1  ;;  %s701_s20 = sphi %s750_s20, %s16_s20   ;;  %s697_s19 = sphi %s748_s19, %s824_s19   ;;  %s693_s18 = sphi %s746_s18, %s823_s18  }
   0x3   : > { %p30_p1 = scmp.ge.s32.totalorder %s28_s21, 2  ;;  %p214_p2 = scmp.lt.s32.totalorder %s701_s20, 3 }
   0x5   : > { %s826_s21 = smov (%p30_p1, %s28_s21), 0  ;;  %p215_p3 = pnand %p601_p0, %p214_p2 }
   0x6   : > { %v677_v0 = vld [vmem:[%s818_s1] sm:$0xff] (!%p215_p3)   ;;  %v703_v1 = vmov (!%p215_p3), 0.0   ;;  %v678_v2 = vld [vmem:[%s818_s1 + $0x8] sm:$0xff] (!%p215_p3)   ;;  %vm704_vm0 = vmmov (!%p215_p3), 0   ;;  %p263_p4 = scmp.lt.s32.totalorder (!%p215_p3), %s693_s18, 1  ;;  %vm320_vm1 = vcmask (!%p215_p3), 261120  }
   0x7   : > { %218 = sbr.rel (%p215_p3) target bundleno = 372 (0x174), region = 32  ;;  %632 = vmatprep.subr.bf16.mxu0 (!%p215_p3), %v703_v1  ;;  %636 = vmatprep.mubr.msk.bf16.mxu0 (!%p215_p3), %vm704_vm0, %v703_v1  ;;  %v609_v5 = vld [vmem:[%s819_s2] ss:$0 sm:$0xff] (!%p215_p3)  ;;  %vm365_vm2 = vcmask (!%p215_p3), 60416   ;;  %s705_s11 = smov (!%p215_p3), 120  }
   0x8   : > { %633 = vmatpush3.bf16.msra.mxu0 (!%p215_p3), %v677_v0  ;;  %s706_s12 = smov (!%p215_p3), 96   ;;  %s707_s13 = smov (!%p215_p3), 88  }
   0x9   : > { %634 = vmatprep.subr.bf16.mxu0 (!%p215_p3), %v703_v1  ;;  %s708_s14 = smov (!%p215_p3), 64   ;;  %s709_s15 = smov (!%p215_p3), 112  }
   0xa   : > { %s710_s16 = smov (!%p215_p3), 56   ;;  %s711_s17 = smov (!%p215_p3), 48  }
   0xb   : > { %s713_s22 = smov (!%p215_p3), 72   ;;  %s714_s23 = smov (!%p215_p3), 104  }
   0xc   : > { %635 = vmatpush3.bf16.msra.mxu0 (!%p215_p3), %v678_v2  ;;  %s715_s24 = smov (!%p215_p3), 40  }
   0xe   : > { %s828_s18 = smov (!%p263_p4, %s693_s18), 1 }
   0xf   : > { %s602_s26 = sshll.u32 %s828_s18, 3  ;;  %s776_s7 = sshll.u32 %s828_s18, 4 }
  0x10   : > { %s269_s29 = scalar_lea.vmem %s817_s0, %s602_s26  ;;  %s782_s10 = scalar_lea.vmem %s820_s3, %s776_s7 }
  0x11   : > { %v295_v3 = vld [vmem:[%s269_s29] sm:$0xff]  ;;  %s712_s18 = smov 80   ;;  %s285_s27 = scalar_lea.vmem %s821_s4, %s776_s7 }
  0x12   : > { %v296_v4 = vpack.c.bf16 %v295_v3, %v295_v3  ;;  %s293_s30 = scalar_lea.vmem %s822_s5, %s776_s7 }
  0x14   : > { %637 = vmatmul.mubr.msk.bf16.vlgmr.msra.gmra.mrb[0].mxu0 %vm320_vm1, %v296_v4 }
  0xe7   : > { %v358_v6 = vpop.f32.mrb[0].mxu0 }
  0xe8   : > { %v359_v7 = vadd.f32 %v609_v5, %v358_v6  ;;  %v638_v8 = vpop.f32.mrb[1].mxu0 }
  0xe9   : > { %v361_v9 = vpop.f32.mrb[2].mxu0 }
  0xea   : > { %v364_v10 = vpack.c.bf16 %v359_v7, %v359_v7  ;;  %v639_v11 = vpop.f32.mrb[3].mxu0 }
  0xec   : > { %378 = vrot.lane.b32.xlu1 %v364_v10, %s705_s11  ;;  %370 = vrot.lane.b32.xlu0 %v364_v10, %s706_s12  ;;  %366 = vst.msk [vmem:[%s782_s10] sm:$0xf] %vm365_vm2, %v364_v10 }
  0xf0   : > { %383 = vrot.lane.b32.xlu1 %v364_v10, %s707_s13  ;;  %374 = vrot.lane.b32.xlu0 %v364_v10, %s708_s14 }
  0xf4   : > { %393 = vrot.lane.b32.xlu1 %v364_v10, %s709_s15  ;;  %388 = vrot.lane.b32.xlu0 %v364_v10, %s710_s16 }
  0xf8   : > { %403 = vrot.lane.b32.xlu1 %v364_v10, %s711_s17  ;;  %398 = vrot.lane.b32.xlu0 %v364_v10, %s712_s18 }
  0xfc   : > { %413 = vrot.lane.b32.xlu1 %v364_v10, %s713_s22  ;;  %408 = vrot.lane.b32.xlu0 %v364_v10, %s714_s23 }
 0x100   : > { %418 = vrot.lane.b32.xlu0 %v364_v10, %s715_s24 }
 0x15e   : > { %v379_v12 = vpop.permute.xlu1 %378  ;;  %v371_v13 = vpop.permute.xlu0 %370 }
 0x15f   : > { %614 = vst.msk [vmem:[%s782_s10 + $0x4] sm:$0xf] %vm365_vm2, %v379_v12  ;;  %373 = vst.msk [vmem:[%s285_s27] sm:$0xf] %vm365_vm2, %v371_v13 }
 0x162   : > { %v384_v14 = vpop.permute.xlu1 %383  ;;  %v375_v15 = vpop.permute.xlu0 %374 }
 0x163   : > { %615 = vst.msk [vmem:[%s285_s27 + $0x4] sm:$0xf] %vm365_vm2, %v384_v14  ;;  %377 = vst.msk [vmem:[%s293_s30] sm:$0xf] %vm365_vm2, %v375_v15 }
 0x166   : > { %v394_v16 = vpop.permute.xlu1 %393  ;;  %v389_v17 = vpop.permute.xlu0 %388 }
 0x167   : > { %617 = vst.msk [vmem:[%s782_s10 + $0x8] sm:$0xf] %vm365_vm2, %v394_v16  ;;  %616 = vst.msk [vmem:[%s293_s30 + $0x4] sm:$0xf] %vm365_vm2, %v389_v17 }
 0x16a   : > { %v404_v18 = vpop.permute.xlu1 %403  ;;  %v399_v19 = vpop.permute.xlu0 %398 }
 0x16b   : > { %619 = vst.msk [vmem:[%s293_s30 + $0x8] sm:$0xf] %vm365_vm2, %v404_v18  ;;  %618 = vst.msk [vmem:[%s285_s27 + $0x8] sm:$0xf] %vm365_vm2, %v399_v19 }
 0x16e   : > { %v414_v20 = vpop.permute.xlu1 %413  ;;  %v409_v21 = vpop.permute.xlu0 %408 }
 0x16f   : > { %621 = vst.msk [vmem:[%s285_s27 + $0xc] sm:$0xf] %vm365_vm2, %v414_v20  ;;  %620 = vst.msk [vmem:[%s782_s10 + $0xc] sm:$0xf] %vm365_vm2, %v409_v21 }
 0x172   : > { %v419_v22 = vpop.permute.xlu0 %418 }
 0x173   : > { %622 = vst.msk [vmem:[%s293_s30 + $0xc] sm:$0xf] %vm365_vm2, %v419_v22 }
 0x174 PF: > { %s16_s20 = sadd.s32 1, %s701_s20   ;;  %s823_s18 = smov %s697_s19 }
 0x175   : > { %p13_p5 = scmp.ge.s32.totalorder %s16_s20, 4   ;;  %s824_s19 = smov %s826_s21 }
 0x177   :  { %15 = sbr.rel (!%p13_p5) target bundleno = 2 (0x2), region = 95 }

// kernel: enhanced_transformer_forward.6
= control target key start
LH: loop header
LB: loop body
LE: loop exit
PB: predicated region body
PF: predicated region fallthrough
CT: control target
= control target key end

     0   :  { %s1858_s29 = smov 0   ;;  %s1860_s30 = smov 0   ;;  %s2048_s0 = inlined_call_operand.vmem [shape: f32[2,8,32], index: 0, kind: input, shape index: {}]   ;;  %s2049_s1 = inlined_call_operand.vmem [shape: bf16[2,4,8,8], index: 1, kind: input, shape index: {}]   ;;  %s2050_s2 = inlined_call_operand.vmem [shape: bf16[2,4,8,8], index: 2, kind: input, shape index: {}]   ;;  %s2051_s3 = inlined_call_operand.vmem [shape: bf16[2,4,8,8], index: 3, kind: input, shape index: {}]   ;;  %s2052_s4 = inlined_call_operand.vmem [shape: bf16[4,8,32], index: 4, kind: input, shape index: {}]   ;;  %s2053_s5 = inlined_call_operand.vmem [shape: f32[1,32], index: 5, kind: input, shape index: {}]   ;;  %s2054_s6 = inlined_call_operand.vmem [shape: bf16[32,64], index: 6, kind: input, shape index: {}]   ;;  %s2055_s7 = inlined_call_operand.vmem [shape: f32[1,64], index: 7, kind: input, shape index: {}]   ;;  %s2056_s8 = inlined_call_operand.vmem [shape: bf16[64,32], index: 8, kind: input, shape index: {}]   ;;  %s2057_s9 = inlined_call_operand.vmem [shape: f32[1,32], index: 9, kind: input, shape index: {}]   ;;  %s2058_s10 = inlined_call_operand.vmem [shape: f32[1,32], index: 10, kind: input, shape index: {}]   ;;  %s2059_s11 = inlined_call_operand.vmem [shape: f32[1,32], index: 11, kind: input, shape index: {}]   ;;  %s2060_s12 = inlined_call_operand.vmem [shape: f32[1,32], index: 12, kind: input, shape index: {}]   ;;  %s2061_s13 = inlined_call_operand.vmem [shape: f32[1,32], index: 13, kind: input, shape index: {}]   ;;  %s2062_s14 = inlined_call_operand.vmem [shape: f32[2,8,32], index: 14, kind: output, shape index: {}]  }
   0x1   :  { %s1862_s15 = smov 0  }
   0x2 LB: > { %s36_s16 = sadd.s32 1, %s1775_s30  ;;  %p1537_p0 = scmp.ge.s32.totalorder %s1779_s15, 1  ;;  %s1779_s15 = sphi %s1862_s15, %s24_s15   ;;  %s1775_s30 = sphi %s1860_s30, %s2064_s30   ;;  %s1771_s29 = sphi %s1858_s29, %s2063_s29  }
   0x3   : > { %p38_p1 = scmp.ge.s32.totalorder %s36_s16, 2  ;;  %p465_p2 = scmp.lt.s32.totalorder %s1779_s15, 3 }
   0x5   : > { %s2066_s16 = smov (%p38_p1, %s36_s16), 0  ;;  %p466_p3 = pnand %p1537_p0, %p465_p2 }
   0x6   : > { %p533_p4 = scmp.lt.s32.totalorder (!%p466_p3), %s1771_s29, 1  ;;  %v1781_v0 = vmov (!%p466_p3), 0.0   ;;  %vm1782_vm0 = vmmov (!%p466_p3), 0   ;;  %vm579_vm1 = vcmask (!%p466_p3), 64512   ;;  %vm815_vm2 = vcmask (!%p466_p3), 1043456  }
   0x7   : > { %469 = sbr.rel (%p466_p3) target bundleno = 2063 (0x80f), region = 76  ;;  %1613 = vmatprep.subr.bf16.mxu0 (!%p466_p3), %v1781_v0  ;;  %1619 = vmatprep.subr.bf16.mxu1 (!%p466_p3), %v1781_v0  ;;  %vm1205_vm3 = vcmask (!%p466_p3), 261120   ;;  %vm1342_vm4 = vcmask (!%p466_p3), 523264  }
   0x8   : > { %1615 = vmatprep.mubr.msk.bf16.mxu0 (!%p466_p3), %vm1782_vm0, %v1781_v0  ;;  %1621 = vmatprep.mubr.msk.bf16.mxu1 (!%p466_p3), %vm1782_vm0, %v1781_v0 }
   0xe   : > { %s2068_s29 = smov (!%p533_p4, %s1771_s29), 1 }
   0xf   : > { %s1885_s17 = sshll.u32 %s2068_s29, 4 }
  0x10   : > { %s552_s20 = scalar_lea.vmem %s2050_s2, %s1885_s17  ;;  %s547_s23 = scalar_lea.vmem %s2049_s1, %s1885_s17 }
  0x11   : > { %v571_v1 = vld [vmem:[%s552_s20] sm:$0xf]  ;;  %v572_v2 = vld [vmem:[%s552_s20 + $0x4] sm:$0xf]  ;;  %v573_v5 = vld [vmem:[%s552_s20 + $0x8] sm:$0xf]  ;;  %s557_s26 = scalar_lea.vmem %s2051_s3, %s1885_s17 }
  0x12   : > { %v584_v3 = vsel %vm579_vm1, %v571_v1, 0  ;;  %v630_v4 = vsel %vm579_vm1, %v572_v2, 0  ;;  %v574_v6 = vld [vmem:[%s552_s20 + $0xc] sm:$0xf]  ;;  %v567_v7 = vld [vmem:[%s547_s23] sm:$0xf] }
  0x13   : > { %1614 = vmatpush3.bf16.xpose.msra.mxu0 %v584_v3  ;;  %1620 = vmatpush3.bf16.xpose.msra.mxu1 %v630_v4  ;;  %v568_v8 = vld [vmem:[%s547_s23 + $0x4] sm:$0xf]  ;;  %v676_v9 = vsel %vm579_vm1, %v573_v5, 0  ;;  %v722_v10 = vsel %vm579_vm1, %v574_v6, 0  ;;  %v569_v11 = vld [vmem:[%s547_s23 + $0x8] sm:$0xf] }
  0x14   : > { %1625 = vmatprep.subr.bf16.mxu0 %v1781_v0  ;;  %1631 = vmatprep.subr.bf16.mxu1 %v1781_v0  ;;  %v570_v12 = vld [vmem:[%s547_s23 + $0xc] sm:$0xf]  ;;  %v575_v53 = vld [vmem:[%s557_s26] sm:$0xf]  ;;  %v576_v55 = vld [vmem:[%s557_s26 + $0x4] sm:$0xf] }
  0x15   : > { %v817_v54 = vsel %vm815_vm2, %v575_v53, 0  ;;  %v863_v56 = vsel %vm815_vm2, %v576_v55, 0  ;;  %v577_v61 = vld [vmem:[%s557_s26 + $0x8] sm:$0xf]  ;;  %v578_v4 = vld [vmem:[%s557_s26 + $0xc] sm:$0xf] }
  0x16   : > { %v909_v2 = vsel %vm815_vm2, %v577_v61, 0  ;;  %s1538_s23 = sshll.u32 %s2068_s29, 3 }
  0x17   : > { %s539_s26 = scalar_lea.vmem %s2048_s0, %s1538_s23  ;;  %s564_s21 = scalar_lea.vmem %s2062_s14, %s1538_s23 }
  0x1a   : > { %1616 = vmatmul.mubr.msk.bf16.vlgmr.msra.gmra.mrb[0].mxu0 %vm579_vm1, %v567_v7  ;;  %1622 = vmatmul.mubr.msk.bf16.vlgmr.msra.gmra.mrb[0].mxu1 %vm579_vm1, %v568_v8  ;;  %v955_v7 = vsel %vm815_vm2, %v578_v4, 0 }
  0x1b   : > { %1626 = vmatpush3.bf16.xpose.msra.mxu0 %v676_v9  ;;  %1632 = vmatpush3.bf16.xpose.msra.mxu1 %v722_v10  ;;  %v1554_v9 = vld [vmem:[%s2052_s4 + $0x4] sm:$0xf] }
  0x1c   : > { %1627 = vmatprep.mubr.msk.bf16.mxu0 %vm1782_vm0, %v1781_v0  ;;  %1633 = vmatprep.mubr.msk.bf16.mxu1 %vm1782_vm0, %v1781_v0 }
  0x1d   : > { %1637 = vmatprep.subr.bf16.mxu0 %v1781_v0  ;;  %1643 = vmatprep.subr.bf16.mxu1 %v1781_v0 }
  0x22   : > { %1628 = vmatmul.mubr.msk.bf16.vlgmr.msra.gmra.mrb[4].mxu0 %vm579_vm1, %v569_v11  ;;  %1634 = vmatmul.mubr.msk.bf16.vlgmr.msra.gmra.mrb[4].mxu1 %vm579_vm1, %v570_v12  ;;  %v1006_v12 = vsel %vm815_vm2, %v1554_v9, 0  ;;  %v1732_v9 = vld [vmem:[%s2054_s6 + $0x8] sm:$0xff]  }
  0x23   : > { %1639 = vmatprep.mubr.msk.bf16.mxu0 %vm1782_vm0, %v1781_v0  ;;  %1645 = vmatprep.mubr.msk.bf16.mxu1 %vm1782_vm0, %v1781_v0 }
  0x24   : > { %1638 = vmatpush3.bf16.msra.mxu0 %v817_v54  ;;  %1644 = vmatpush3.bf16.msra.mxu1 %v863_v56  ;;  %v1561_v56 = vld [vmem:[%s2053_s5] ss:$0 sm:$0xff] }
  0x25   : > { %1649 = vmatprep.subr.bf16.mxu0 %v1781_v0  ;;  %1655 = vmatprep.subr.bf16.mxu1 %v1781_v0 }
  0xed   : > { %v620_v13 = vpop.f32.mrb[0].mxu0  ;;  %v666_v14 = vpop.f32.mrb[0].mxu1 }
  0xee   : > { %v1617_v15 = vpop.f32.mrb[1].mxu0  ;;  %v1623_v16 = vpop.f32.mrb[1].mxu1  ;;  %v764_v17 = vsel %vm579_vm1, %v620_v13, -inf  ;;  %v767_v22 = vsel %vm579_vm1, %v666_v14, -inf }
  0xef   : > { %765 = vmax.xlane.f32.xlu0 %v764_v17  ;;  %v623_v18 = vpop.f32.mrb[2].mxu0  ;;  %v669_v19 = vpop.f32.mrb[2].mxu1  ;;  %v998_v16 = vld [vmem:[%s2052_s4] sm:$0xf] }
  0xf0   : > { %v1618_v20 = vpop.f32.mrb[3].mxu0  ;;  %v1624_v21 = vpop.f32.mrb[3].mxu1  ;;  %v1052_v17 = vsel %vm815_vm2, %v998_v16, 0  ;;  %v1559_v18 = vld [vmem:[%s2052_s4 + $0xc] sm:$0xf] }
  0xf1   : > { %v1562_v16 = vld [vmem:[%s2058_s10] ss:$0 sm:$0xff] }
  0xf3   : > { %768 = vmax.xlane.f32.xlu0 %v767_v22  ;;  %v1151_v22 = vsel %vm815_vm2, %v1559_v18, 0  ;;  %v1563_v18 = vld [vmem:[%s2059_s11] ss:$0 sm:$0xff] }
  0xf5   : > { %v712_v23 = vpop.f32.mrb[4].mxu0  ;;  %v758_v24 = vpop.f32.mrb[4].mxu1 }
  0xf6   : > { %v1629_v25 = vpop.f32.mrb[5].mxu0  ;;  %v770_v26 = vsel %vm579_vm1, %v712_v23, -inf  ;;  %v1635_v27 = vpop.f32.mrb[5].mxu1  ;;  %v773_v32 = vsel %vm579_vm1, %v758_v24, -inf }
  0xf7   : > { %771 = vmax.xlane.f32.xlu1 %v770_v26  ;;  %v715_v28 = vpop.f32.mrb[6].mxu0  ;;  %v761_v29 = vpop.f32.mrb[6].mxu1 }
  0xf8   : > { %v1630_v30 = vpop.f32.mrb[7].mxu0  ;;  %v1636_v31 = vpop.f32.mrb[7].mxu1 }
  0xfb   : > { %774 = vmax.xlane.f32.xlu1 %v773_v32 }
 0x17c   : > { %v766_v33 = vpop.xlane.xlu0 %765 }
 0x17d   : > { %v776_v34 = vsub.f32 %v620_v13, %v766_v33 }
 0x17f   : > { %v780_v35 = vmul.f32 1.442695, %v776_v34 }
 0x180   : > { %v769_v36 = vpop.xlane.xlu0 %768 }
 0x181   : > { %1737 = vpow2.f32 %v780_v35  ;;  %v777_v37 = vsub.f32 %v666_v14, %v769_v36 }
 0x183   : > { %v782_v38 = vmul.f32 1.442695, %v777_v37 }
 0x184   : > { %v772_v39 = vpop.xlane.xlu1 %771 }
 0x185   : > { %1739 = vpow2.f32 %v782_v38  ;;  %v778_v40 = vsub.f32 %v712_v23, %v772_v39 }
 0x187   : > { %v784_v41 = vmul.f32 1.442695, %v778_v40 }
 0x188   : > { %v775_v42 = vpop.xlane.xlu1 %774 }
 0x189   : > { %1741 = vpow2.f32 %v784_v41  ;;  %v779_v43 = vsub.f32 %v758_v24, %v775_v42  ;;  %v1557_v24 = vld [vmem:[%s2052_s4 + $0x8] sm:$0xf] }
 0x18a   : > { %v1101_v29 = vsel %vm815_vm2, %v1557_v24, 0  ;;  %v1564_v24 = vld [vmem:[%s2055_s7] ss:$0 sm:$0xff] }
 0x18b   : > { %v1738_v44 = vpop.eup %1737  ;;  %v786_v45 = vmul.f32 1.442695, %v779_v43 }
 0x18c   : > { %v788_v46 = vsel %vm579_vm1, %v1738_v44, 0.0 }
 0x18d   : > { %1743 = vpow2.f32 %v786_v45  ;;  %789 = vadd.xlane.f32.xlu0 %v788_v46 }
 0x18f   : > { %v1740_v47 = vpop.eup %1739 }
 0x190   : > { %v791_v48 = vsel %vm579_vm1, %v1740_v47, 0.0 }
 0x191   : > { %792 = vadd.xlane.f32.xlu1 %v791_v48 }
 0x193   : > { %v1742_v49 = vpop.eup %1741 }
 0x194   : > { %v794_v50 = vsel %vm579_vm1, %v1742_v49, 0.0 }
 0x195   : > { %795 = vadd.xlane.f32.xlu0 %v794_v50 }
 0x197   : > { %v1744_v51 = vpop.eup %1743 }
 0x198   : > { %v797_v52 = vsel %vm579_vm1, %v1744_v51, 0.0 }
 0x199   : > { %798 = vadd.xlane.f32.xlu1 %v797_v52 }
 0x21a   : > { %v790_v57 = vpop.xlane.xlu0 %789 }
 0x21b   : > { %1745 = vrcp.f32 %v790_v57 }
 0x21e   : > { %v793_v58 = vpop.xlane.xlu1 %792 }
 0x21f   : > { %1747 = vrcp.f32 %v793_v58 }
 0x222   : > { %v796_v59 = vpop.xlane.xlu0 %795 }
 0x223   : > { %1749 = vrcp.f32 %v796_v59 }
 0x225   : > { %v1746_v60 = vpop.eup %1745 }
 0x226   : > { %v804_v62 = vmul.f32 %v1746_v60, %v1738_v44  ;;  %v799_v63 = vpop.xlane.xlu1 %798 }
 0x227   : > { %1751 = vrcp.f32 %v799_v63 }
 0x228   : > { %v808_v1 = vpack.c.bf16 %v804_v62, %v804_v62  ;;  %v566_v62 = vld [vmem:[%s539_s26] sm:$0xff] }
 0x229   : > { %v1748_v3 = vpop.eup %1747 }
 0x22a   : > { %v805_v5 = vmul.f32 %v1748_v3, %v1740_v47  ;;  %1640 = vmatmul.mubr.msk.bf16.vlgmr.msra.gmra.mrb[8].mxu0 %vm579_vm1, %v808_v1 }
 0x22b   : > { %1650 = vmatpush3.bf16.msra.mxu0 %v909_v2  ;;  %1651 = vmatprep.mubr.msk.bf16.mxu0 %vm1782_vm0, %v1781_v0 }
 0x22c   : > { %v809_v6 = vpack.c.bf16 %v805_v5, %v805_v5  ;;  %1661 = vmatprep.subr.bf16.mxu0 %v1781_v0 }
 0x22d   : > { %v1750_v8 = vpop.eup %1749 }
 0x22e   : > { %v806_v10 = vmul.f32 %v1750_v8, %v1742_v49  ;;  %1646 = vmatmul.mubr.msk.bf16.vlgmr.msra.gmra.mrb[8].mxu1 %vm579_vm1, %v809_v6  ;;  %v1731_v8 = vld [vmem:[%s2054_s6] sm:$0xff]  }
 0x22f   : > { %1656 = vmatpush3.bf16.msra.mxu1 %v955_v7  ;;  %1657 = vmatprep.mubr.msk.bf16.mxu1 %vm1782_vm0, %v1781_v0 }
 0x230   : > { %v810_v11 = vpack.c.bf16 %v806_v10, %v806_v10  ;;  %1667 = vmatprep.subr.bf16.mxu1 %v1781_v0  ;;  %v1733_v10 = vld [vmem:[%s2056_s8] sm:$0xff]  }
 0x231   : > { %v1752_v13 = vpop.eup %1751 }
 0x232   : > { %v807_v14 = vmul.f32 %v1752_v13, %v1744_v51  ;;  %1652 = vmatmul.mubr.msk.bf16.vlgmr.msra.gmra.mrb[12].mxu0 %vm579_vm1, %v810_v11  ;;  %v1734_v11 = vld [vmem:[%s2056_s8 + $0x8] sm:$0xff]  }
 0x233   : > { %1662 = vmatpush3.bf16.msra.mxu0 %v1006_v12  ;;  %1663 = vmatprep.mubr.msk.bf16.mxu0 %vm1782_vm0, %v1781_v0 }
 0x234   : > { %v811_v15 = vpack.c.bf16 %v807_v14, %v807_v14  ;;  %1673 = vmatprep.subr.bf16.mxu0 %v1781_v0 }
 0x236   : > { %1658 = vmatmul.mubr.msk.bf16.vlgmr.msra.gmra.mrb[12].mxu1 %vm579_vm1, %v811_v15 }
 0x237   : > { %1669 = vmatprep.mubr.msk.bf16.mxu1 %vm1782_vm0, %v1781_v0  ;;  %1668 = vmatpush3.bf16.msra.mxu1 %v1052_v17 }
 0x238   : > { %1679 = vmatprep.subr.bf16.mxu1 %v1781_v0 }
 0x2fd   : > { %v853_v19 = vpop.f32.mrb[8].mxu0 }
 0x2fe   : > { %v997_v20 = vpack.c.bf16 %v853_v19, %v853_v19  ;;  %v1641_v21 = vpop.f32.mrb[9].mxu0 }
 0x2ff   : > { %v856_v23 = vpop.f32.mrb[10].mxu0 }
 0x300   : > { %v1642_v25 = vpop.f32.mrb[11].mxu0  ;;  %1670 = vmatmul.mubr.msk.bf16.vlgmr.msra.gmra.mrb[16].mxu1 %vm579_vm1, %v997_v20  ;;  %v1736_v23 = vld [vmem:[%s2056_s8 + $0x18] sm:$0xff]  }
 0x301   : > { %v899_v26 = vpop.f32.mrb[8].mxu1  ;;  %1680 = vmatpush3.bf16.msra.mxu1 %v1151_v22  ;;  %1681 = vmatprep.mubr.msk.bf16.mxu1 %vm1782_vm0, %v1781_v0  ;;  %v1735_v22 = vld [vmem:[%s2056_s8 + $0x10] sm:$0xff]  }
 0x302   : > { %v999_v27 = vpack.c.bf16 %v899_v26, %v899_v26  ;;  %v1647_v28 = vpop.f32.mrb[9].mxu1  ;;  %1693 = vmatprep.subr.bf16.mxu1 %v1781_v0 }
 0x303   : > { %v902_v30 = vpop.f32.mrb[10].mxu1 }
 0x304   : > { %v1648_v31 = vpop.f32.mrb[11].mxu1  ;;  %1664 = vmatmul.mubr.msk.bf16.vlgmr.msra.gmra.mrb[16].mxu0 %vm579_vm1, %v999_v27 }
 0x305   : > { %1674 = vmatpush3.bf16.msra.mxu0 %v1101_v29  ;;  %v945_v32 = vpop.f32.mrb[12].mxu0  ;;  %1675 = vmatprep.mubr.msk.bf16.mxu0 %vm1782_vm0, %v1781_v0 }
 0x306   : > { %v1653_v33 = vpop.f32.mrb[13].mxu0  ;;  %1685 = vmatprep.subr.bf16.mxu0 %v1781_v0  ;;  %v1094_v37 = vpack.c.bf16 %v945_v32, %v945_v32 }
 0x307   : > { %v948_v34 = vpop.f32.mrb[14].mxu0 }
 0x308   : > { %v1654_v35 = vpop.f32.mrb[15].mxu0 }
 0x309   : > { %v991_v36 = vpop.f32.mrb[12].mxu1 }
 0x30a   : > { %v1144_v38 = vpack.c.bf16 %v991_v36, %v991_v36  ;;  %v1659_v39 = vpop.f32.mrb[13].mxu1 }
 0x30b   : > { %v994_v40 = vpop.f32.mrb[14].mxu1 }
 0x30c   : > { %v1660_v41 = vpop.f32.mrb[15].mxu1  ;;  %1676 = vmatmul.mubr.msk.bf16.vlgmr.msra.gmra.mrb[20].mxu0 %vm579_vm1, %v1094_v37  ;;  %1682 = vmatmul.mubr.msk.bf16.vlgmr.msra.gmra.mrb[20].mxu1 %vm579_vm1, %v1144_v38 }
 0x30d   : > { %1689 = vmatprep.mubr.msk.bf16.mxu0 %vm1782_vm0, %v1781_v0  ;;  %1701 = vmatprep.mubr.msk.bf16.mxu1 %vm1782_vm0, %v1781_v0 }
 0x30e   : > { %1686 = vmatpush3.bf16.msra.mxu0 %v1731_v8  ;;  %1694 = vmatpush3.bf16.msra.mxu1 %v1733_v10 }
 0x30f   : > { %1687 = vmatprep.subr.bf16.mxu0 %v1781_v0  ;;  %1695 = vmatprep.subr.bf16.mxu1 %v1781_v0 }
 0x312   : > { %1688 = vmatpush3.bf16.msra.mxu0 %v1732_v9  ;;  %1696 = vmatpush3.bf16.msra.mxu1 %v1734_v11 }
 0x313   : > { %1697 = vmatprep.subr.bf16.mxu1 %v1781_v0 }
 0x316   : > { %1698 = vmatpush3.bf16.msra.mxu1 %v1735_v22 }
 0x317   : > { %1699 = vmatprep.subr.bf16.mxu1 %v1781_v0  ;;  %v1568_v0 = vld [vmem:[%s2057_s9] ss:$0 sm:$0xff] }
 0x31a   : > { %1700 = vmatpush3.bf16.msra.mxu1 %v1736_v23 }
 0x3d3   : > { %v1088_v42 = vpop.f32.mrb[16].mxu1 }
 0x3d4   : > { %v1671_v43 = vpop.f32.mrb[17].mxu1 }
 0x3d5   : > { %v1091_v44 = vpop.f32.mrb[18].mxu1 }
 0x3d6   : > { %v1672_v45 = vpop.f32.mrb[19].mxu1 }
 0x3d7   : > { %v1042_v46 = vpop.f32.mrb[16].mxu0 }
 0x3d8   : > { %v1089_v47 = vadd.f32 %v1088_v42, %v1042_v46  ;;  %v1665_v48 = vpop.f32.mrb[17].mxu0 }
 0x3d9   : > { %v1045_v49 = vpop.f32.mrb[18].mxu0  ;;  %v1574_v48 = vld [vmem:[%s2060_s12] ss:$0 sm:$0xff] }
 0x3da   : > { %v1666_v50 = vpop.f32.mrb[19].mxu0 }
 0x3db   : > { %v1575_v50 = vld [vmem:[%s2061_s13] ss:$0 sm:$0xff] }
 0x3df   : > { %v1137_v51 = vpop.f32.mrb[20].mxu0  ;;  %v1187_v52 = vpop.f32.mrb[20].mxu1 }
 0x3e0   : > { %v1143_v53 = vadd.f32 %v1137_v51, %v1089_v47  ;;  %v1677_v54 = vpop.f32.mrb[21].mxu0  ;;  %v1683_v55 = vpop.f32.mrb[21].mxu1 }
 0x3e1   : > { %v1140_v57 = vpop.f32.mrb[22].mxu0  ;;  %v1190_v58 = vpop.f32.mrb[22].mxu1 }
 0x3e2   : > { %v1193_v59 = vadd.f32 %v1187_v52, %v1143_v53  ;;  %v1678_v60 = vpop.f32.mrb[23].mxu0  ;;  %v1684_v61 = vpop.f32.mrb[23].mxu1 }
 0x3e4   : > { %v1201_v63 = vadd.f32 %v1561_v56, %v1193_v59 }
 0x3e6   : > { %v1202_v1 = vadd.f32 %v1201_v63, %v566_v62 }
 0x3e8   : > { %v1206_v2 = vsel %vm1205_vm3, %v1202_v1, 0.0 }
 0x3e9   : > { %1207 = vadd.xlane.f32.xlu0 %v1206_v2 }
 0x476   : > { %v1208_v3 = vpop.xlane.xlu0 %1207 }
 0x477   : > { %v1210_v4 = vmul.f32 0.03125, %v1208_v3 }
 0x479   : > { %v1211_v5 = vsub.f32 %v1202_v1, %v1210_v4 }
 0x47b   : > { %v1212_v6 = vmul.f32 %v1211_v5, %v1211_v5 }
 0x47d   : > { %v1213_v7 = vsel %vm1205_vm3, %v1212_v6, 0.0 }
 0x47e   : > { %1214 = vadd.xlane.f32.xlu1 %v1213_v7 }
 0x50b   : > { %v1215_v12 = vpop.xlane.xlu1 %1214 }
 0x50c   : > { %v1216_v13 = vmul.f32 0.03125, %v1215_v12 }
 0x50e   : > { %v1217_v14 = vadd.f32 1e-05, %v1216_v13 }
 0x510   : > { %1753 = vrsqrt.f32 %v1217_v14 }
 0x51a   : > { %v1754_v15 = vpop.eup %1753 }
 0x51b   : > { %v1219_v17 = vmul.f32 %v1754_v15, %v1211_v5 }
 0x51d   : > { %v1226_v19 = vmul.f32 %v1562_v16, %v1219_v17 }
 0x51f   : > { %v1233_v20 = vadd.f32 %v1563_v18, %v1226_v19 }
 0x521   : > { %v1234_v21 = vpack.c.bf16 %v1233_v20, %v1233_v20 }
 0x523   : > { %1690 = vmatmul.mubr.msk.bf16.vlgmr.msra.gmra.mrb[24].mxu0 %vm1205_vm3, %v1234_v21 }
 0x5f6   : > { %v1295_v25 = vpop.f32.mrb[24].mxu0 }
 0x5f7   : > { %v1296_v26 = vadd.f32 %v1564_v24, %v1295_v25  ;;  %v1691_v27 = vpop.f32.mrb[25].mxu0 }
 0x5f8   : > { %v1298_v28 = vpop.f32.mrb[26].mxu0 }
 0x5f9   : > { %v1301_v29 = vmax.f32 %v1296_v26, 0.0  ;;  %v1692_v30 = vpop.f32.mrb[27].mxu0 }
 0x5fb   : > { %v1302_v31 = vpack.c.bf16 %v1301_v29, %v1301_v29 }
 0x5fd   : > { %1702 = vmatmul.mubr.msk.bf16.vlgmr.msra.gmra.mrb[24].mxu1 %vm1342_vm4, %v1302_v31 }
 0x6d0   : > { %v1380_v32 = vpop.f32.mrb[24].mxu1 }
 0x6d1   : > { %v1381_v33 = vadd.f32 %v1568_v0, %v1380_v32  ;;  %v1703_v34 = vpop.f32.mrb[25].mxu1 }
 0x6d2   : > { %v1383_v35 = vpop.f32.mrb[26].mxu1 }
 0x6d3   : > { %v1704_v36 = vpop.f32.mrb[27].mxu1  ;;  %v1386_v37 = vadd.f32 %v1381_v33, %v1233_v20 }
 0x6d5   : > { %v1389_v38 = vsel %vm1205_vm3, %v1386_v37, 0.0 }
 0x6d6   : > { %1390 = vadd.xlane.f32.xlu0 %v1389_v38 }
 0x763   : > { %v1391_v39 = vpop.xlane.xlu0 %1390 }
 0x764   : > { %v1392_v40 = vmul.f32 0.03125, %v1391_v39 }
 0x766   : > { %v1393_v41 = vsub.f32 %v1386_v37, %v1392_v40 }
 0x768   : > { %v1394_v42 = vmul.f32 %v1393_v41, %v1393_v41 }
 0x76a   : > { %v1395_v43 = vsel %vm1205_vm3, %v1394_v42, 0.0 }
 0x76b   : > { %1396 = vadd.xlane.f32.xlu1 %v1395_v43 }
 0x7f8   : > { %v1397_v44 = vpop.xlane.xlu1 %1396 }
 0x7f9   : > { %v1398_v45 = vmul.f32 0.03125, %v1397_v44 }
 0x7fb   : > { %v1399_v46 = vadd.f32 1e-05, %v1398_v45 }
 0x7fd   : > { %1755 = vrsqrt.f32 %v1399_v46 }
 0x807   : > { %v1756_v47 = vpop.eup %1755 }
 0x808   : > { %v1401_v49 = vmul.f32 %v1756_v47, %v1393_v41 }
 0x80a   : > { %v1408_v51 = vmul.f32 %v1574_v48, %v1401_v49 }
 0x80c   : > { %v1415_v52 = vadd.f32 %v1575_v50, %v1408_v51 }
 0x80e   : > { %1416 = vst.msk [vmem:[%s564_s21] sm:$0xff] %vm1205_vm3, %v1415_v52 }
 0x80f PF: > { %s24_s15 = sadd.s32 1, %s1779_s15   ;;  %s2063_s29 = smov %s1775_s30 }
 0x810   : > { %p21_p5 = scmp.ge.s32.totalorder %s24_s15, 4   ;;  %s2064_s30 = smov %s2066_s16 }
 0x812   :  { %23 = sbr.rel (!%p21_p5) target bundleno = 2 (0x2), region = 118 }

</bundles_post_ra>
